<compile_context>
chip_gen: v6e
topology: v6e:2x2x1
jax: 0.10.0
libtpu: 0.0.40
codegen_flags: <defaults>
</compile_context>

<pallas_src>
import functools

import jax
import jax.numpy as jnp
from jax import lax
from jax.experimental import pallas as pl
from jax.experimental.pallas import tpu as pltpu

LN_EPS = 1e-12        # DistilBERT LayerNorm eps
MASK_BIG = 1e9        # additive key-padding bias magnitude


def _layer_norm(x, gamma, beta):
    x = x.astype(jnp.float32)
    mean = jnp.mean(x, axis=-1, keepdims=True)
    var = jnp.mean(jnp.square(x - mean), axis=-1, keepdims=True)
    return (x - mean) * lax.rsqrt(var + LN_EPS) * gamma + beta


def _gelu(x):
    # exact (erf) GELU — DistilBERT's default "gelu" activation
    return 0.5 * x * (1.0 + lax.erf(x * 0.7071067811865476))


# ----------------------------- fused Pallas kernel ---------------------------

def _encoder_kernel(emb_ref, bias_ref, embg_ref, embb_ref,
                    wqkv_ref, bqkv_ref, wo_ref, bo_ref, ln1g_ref, ln1b_ref,
                    w1_ref, b1_ref, w2_ref, b2_ref, ln2g_ref, ln2b_ref,
                    o_ref, x_scr, sa_scr, *, n_heads, ffn_chunk):
    layer = pl.program_id(1)
    n_layers = pl.num_programs(1)

    Bb, S, D = emb_ref.shape          # batch block, sequence, model dim
    M = Bb * S
    dh = D // n_heads

    @pl.when(layer == 0)
    def _():
        # embedding LayerNorm folded into the first step of the layer axis
        x0 = _layer_norm(emb_ref[...], embg_ref[...], embb_ref[...])
        x_scr[...] = x0.reshape(M, D)

    x = x_scr[...]                    # (M, D) f32 residual stream, VMEM-resident
    x_bf = x.astype(jnp.bfloat16)

    # ---- fused QKV projection: one (M x D) @ (D x 3D) MXU pass, bf16 operands.
    # 1/sqrt(dh) is folded into the Q slab offline; single bf16 cast, then slice.
    qkv = jnp.dot(x_bf, wqkv_ref[0], preferred_element_type=jnp.float32) + bqkv_ref[0]
    qkv_bf = qkv.astype(jnp.bfloat16).reshape(Bb, S, 3 * D)

    # key-padding additive bias, broadcast hoisted out of the head loop
    mask_full = jnp.broadcast_to(bias_ref[...], (Bb, S, S))

    # ---- multi-head attention with fused per-head output projection.
    # Head context never hits a sub-128-lane scratch slab: each head's
    # (M, dh) @ (dh, D) output projection accumulates into a lane-dense f32 slab.
    sa_scr[...] = jnp.zeros_like(sa_scr)
    for h in range(n_heads):
        q = qkv_bf[:, :, h * dh:(h + 1) * dh]
        k = qkv_bf[:, :, D + h * dh:D + (h + 1) * dh]
        v = qkv_bf[:, :, 2 * D + h * dh:2 * D + (h + 1) * dh]
        s = jnp.einsum("bqd,bkd->bqk", q, k,
                       preferred_element_type=jnp.float32)        # (Bb, S, S)
        s = s + mask_full
        s = s - jnp.max(s, axis=-1, keepdims=True)
        p = jnp.exp(s)
        p = p * pl.reciprocal(jnp.sum(p, axis=-1, keepdims=True), approx=True)
        ctx = jnp.einsum("bqk,bkd->bqd", p.astype(jnp.bfloat16), v,
                         preferred_element_type=jnp.float32)       # (Bb, S, dh)
        sa_scr[...] += jnp.dot(ctx.reshape(M, dh).astype(jnp.bfloat16),
                               wo_ref[0, h], preferred_element_type=jnp.float32)

    x1 = _layer_norm(x + sa_scr[...] + bo_ref[0], ln1g_ref[0], ln1b_ref[0])

    # ---- FFN: hidden dim processed in chunks so the (M, H) temporary stays small
    x1_bf = x1.astype(jnp.bfloat16)
    H = w1_ref.shape[-1]
    ffn = jnp.zeros((M, D), jnp.float32)
    for c in range(0, H, ffn_chunk):
        h1 = _gelu(jnp.dot(x1_bf, w1_ref[0, :, c:c + ffn_chunk],
                           preferred_element_type=jnp.float32)
                   + b1_ref[0, :, c:c + ffn_chunk])
        ffn = ffn + jnp.dot(h1.astype(jnp.bfloat16), w2_ref[0, c:c + ffn_chunk, :],
                            preferred_element_type=jnp.float32)
    x2 = _layer_norm(x1 + ffn + b2_ref[0], ln2g_ref[0], ln2b_ref[0])

    x_scr[...] = x2                   # carry residual stream to the next layer

    # TODO(synk): last-layer CLS-row-only specialization (skip ~(S-1)/S of the
    # final layer's attention/FFN FLOPs) left out to keep the kernel simple.
    @pl.when(layer == n_layers - 1)
    def _():
        o_ref[...] = x2.reshape(Bb, S, D)[:, 0:1, :].astype(o_ref.dtype)  # CLS rows


# ------------------------------ sizing helpers --------------------------------

def _vmem_capacity_bytes():
    try:
        info = pltpu.get_tpu_info()
        cap = getattr(info, "vmem_capacity_bytes", None)
        if cap:
            return int(cap)
    except Exception:
        pass
    return 64 * 1024 * 1024           # v7x per-TensorCore capacity (most restrictive)


def _ffn_chunk_size(H):
    return 1024 if (H > 1024 and H % 1024 == 0) else H


def _weight_bytes(D, H):
    # bf16 weight slabs + f32 biases / LN params, double-buffered by the pipeline
    per = (D * 3 * D + D * D + 2 * D * H) * 2 + (3 * D + 6 * D + H) * 4
    return 2 * per


def _activation_bytes(Bb, S, D, H):
    M = Bb * S
    hc = _ffn_chunk_size(H)
    return int(2 * Bb * S * D * 4          # embedding block (double buffered)
               + 2 * M * D * 4             # residual stream + self-attn accumulator
               + M * 3 * D * (4 + 2)       # fused QKV (f32 + bf16)
               + 3 * Bb * S * S * 4        # score / prob temporaries
               + M * hc * (4 + 2)          # FFN hidden chunk (f32 + bf16)
               + 3 * M * D * 4)            # residual / LN temporaries headroom


def _pick_batch_block(B, S, D, H, vmem_cap):
    budget = int(0.6 * vmem_cap) - _weight_bytes(D, H)
    bb = 1
    for cand in (2, 4, 8, 16):
        if cand > B:
            break
        if _activation_bytes(cand, S, D, H) <= budget:
            bb = cand
    if B >= 2:
        bb = min(bb, -(-B // 2))      # keep >= 2 batch blocks (both v7x TensorCores busy)
    return max(1, bb)


def _vmem_limit_bytes(Bb, S, D, H, vmem_cap):
    total = _weight_bytes(D, H) + _activation_bytes(Bb, S, D, H) + (8 << 20)
    # never request more than ~85% of physical VMEM (v7x has only 64 MiB/TC)
    return int(min(max(total, 32 << 20), int(0.85 * vmem_cap)))


# ------------------------------ model wrapper ---------------------------------

_STACK_KEYS = ("wqkv", "bqkv", "wo", "bo", "ln1_g", "ln1_b",
               "w1", "b1", "w2", "b2", "ln2_g", "ln2_b")


def prepare_encoder_weights(params, n_heads):
    """Stack per-layer weights along a leading layer axis. Matmul operands are
    bf16; biases / LN params stay f32. 1/sqrt(dh) is folded into the Q slab and
    the output projection is pre-split per head: (L, n_heads, dh, D)."""
    layers = params["layers"]
    L = len(layers)
    D = layers[0]["wq"].shape[0]
    dh = D // n_heads
    scale = 1.0 / float(dh) ** 0.5
    stk = lambda key: jnp.stack([lyr[key] for lyr in layers])
    wqkv = jnp.concatenate([stk("wq") * scale, stk("wk"), stk("wv")], axis=-1)
    bqkv = jnp.concatenate([stk("bq") * scale, stk("bk"), stk("bv")], axis=-1)
    wo = stk("wo").reshape(L, n_heads, dh, D)      # rows h*dh:(h+1)*dh -> head h
    return dict(
        wqkv=wqkv.astype(jnp.bfloat16), bqkv=bqkv.astype(jnp.float32),
        wo=wo.astype(jnp.bfloat16), bo=stk("bo").astype(jnp.float32),
        ln1_g=stk("ln1_g").astype(jnp.float32), ln1_b=stk("ln1_b").astype(jnp.float32),
        w1=stk("w1").astype(jnp.bfloat16), b1=stk("b1").astype(jnp.float32),
        w2=stk("w2").astype(jnp.bfloat16), b2=stk("b2").astype(jnp.float32),
        ln2_g=stk("ln2_g").astype(jnp.float32), ln2_b=stk("ln2_b").astype(jnp.float32),
    )


def text_encoder_forward(input_ids, params, n_heads, padding_value=0):
    """Returns (batch, dim): hidden state of the CLS token (index 0)."""
    B, S = input_ids.shape
    D = params["word_emb"].shape[1]
    L = len(params["layers"])
    H = params["layers"][0]["w1"].shape[1]

    vmem_cap = _vmem_capacity_bytes()
    Bb = _pick_batch_block(B, S, D, H, vmem_cap)
    B_pad = -(-B // Bb) * Bb
    if B_pad != B:
        pad = jnp.full((B_pad - B, S), padding_value, input_ids.dtype)
        ids = jnp.concatenate([input_ids, pad], axis=0)
    else:
        ids = input_ids

    # TODO(synk): embedding row gather (data-dependent lookup) stays in plain JAX.
    emb = (params["word_emb"][ids]
           + params["pos_emb"][jnp.arange(S)][None, :, :]).astype(jnp.float32)
    # Key-padding mask as an additive bias: 0 for real tokens, -1e9 for pads.
    mask_bias = ((ids == padding_value).astype(jnp.float32) * -MASK_BIG)[:, None, :]

    stacked = prepare_encoder_weights(params, n_heads)
    weights = [stacked[k] for k in _STACK_KEYS]
    ffn_chunk = _ffn_chunk_size(H)

    def layer_spec(a):
        nd = a.ndim
        return pl.BlockSpec((1,) + a.shape[1:],
                            lambda b, l, nd=nd: (l,) + (0,) * (nd - 1))

    in_specs = ([pl.BlockSpec((Bb, S, D), lambda b, l: (b, 0, 0)),
                 pl.BlockSpec((Bb, 1, S), lambda b, l: (b, 0, 0)),
                 pl.BlockSpec((1, D), lambda b, l: (0, 0)),
                 pl.BlockSpec((1, D), lambda b, l: (0, 0))]
                + [layer_spec(a) for a in weights])

    out = pl.pallas_call(
        functools.partial(_encoder_kernel, n_heads=n_heads, ffn_chunk=ffn_chunk),
        out_shape=jax.ShapeDtypeStruct((B_pad, 1, D), jnp.float32),
        grid=(B_pad // Bb, L),
        in_specs=in_specs,
        out_specs=pl.BlockSpec((Bb, 1, D), lambda b, l: (b, 0, 0)),
        scratch_shapes=[pltpu.VMEM((Bb * S, D), jnp.float32),    # residual stream
                        pltpu.VMEM((Bb * S, D), jnp.float32)],   # self-attn accumulator
        compiler_params=pltpu.CompilerParams(
            dimension_semantics=("parallel", "arbitrary"),
            vmem_limit_bytes=_vmem_limit_bytes(Bb, S, D, H, vmem_cap)),
    )(emb, mask_bias, params["emb_ln_g"], params["emb_ln_b"], *weights)

    return out[:B, 0, :]     # target_token_idx = 0 (drop batch padding)


def init_params(key, vocab_size, max_pos, dim, hidden_dim, n_layers):
    std = 0.02
    keys = jax.random.split(key, 2 + n_layers)
    params = {
        "word_emb": std * jax.random.normal(keys[0], (vocab_size, dim), jnp.float32),
        "pos_emb": std * jax.random.normal(keys[1], (max_pos, dim), jnp.float32),
        "emb_ln_g": jnp.ones((1, dim), jnp.float32),
        "emb_ln_b": jnp.zeros((1, dim), jnp.float32),
        "layers": [],
    }
    for l in range(n_layers):
        lk = jax.random.split(keys[2 + l], 12)
        layer = {
            "wq": std * jax.random.normal(lk[0], (dim, dim), jnp.float32),
            "bq": std * jax.random.normal(lk[1], (1, dim), jnp.float32),
            "wk": std * jax.random.normal(lk[2], (dim, dim), jnp.float32),
            "bk": std * jax.random.normal(lk[3], (1, dim), jnp.float32),
            "wv": std * jax.random.normal(lk[4], (dim, dim), jnp.float32),
            "bv": std * jax.random.normal(lk[5], (1, dim), jnp.float32),
            "wo": std * jax.random.normal(lk[6], (dim, dim), jnp.float32),
            "bo": std * jax.random.normal(lk[7], (1, dim), jnp.float32),
            "ln1_g": jnp.ones((1, dim), jnp.float32),
            "ln1_b": jnp.zeros((1, dim), jnp.float32),
            "w1": std * jax.random.normal(lk[8], (dim, hidden_dim), jnp.float32),
            "b1": std * jax.random.normal(lk[9], (1, hidden_dim), jnp.float32),
            "w2": std * jax.random.normal(lk[10], (hidden_dim, dim), jnp.float32),
            "b2": std * jax.random.normal(lk[11], (1, dim), jnp.float32),
            "ln2_g": jnp.ones((1, dim), jnp.float32),
            "ln2_b": jnp.zeros((1, dim), jnp.float32),
        }
        params["layers"].append(layer)
    return params


# --------------------------- pure-JAX reference -------------------------------

def reference_forward(input_ids, params, n_heads, padding_value=0):
    B, S = input_ids.shape
    D = params["layers"][0]["wq"].shape[0]
    dh = D // n_heads
    neg_inf = jnp.finfo(jnp.float32).min

    def lin(t, w, b):
        return jnp.einsum("bsd,de->bse", t, w, precision=lax.Precision.HIGHEST) + b

    emb = params["word_emb"][input_ids] + params["pos_emb"][jnp.arange(S)][None, :, :]
    x = _layer_norm(emb, params["emb_ln_g"], params["emb_ln_b"])
    keep = (input_ids != padding_value)[:, None, None, :]    # (B,1,1,S)

    for layer in params["layers"]:
        q = lin(x, layer["wq"], layer["bq"])
        k = lin(x, layer["wk"], layer["bk"])
        v = lin(x, layer["wv"], layer["bv"])
        split = lambda t: t.reshape(B, S, n_heads, dh).transpose(0, 2, 1, 3)
        qh, kh, vh = split(q) / float(dh) ** 0.5, split(k), split(v)
        scores = jnp.einsum("bhqd,bhkd->bhqk", qh, kh, precision=lax.Precision.HIGHEST)
        scores = jnp.where(keep, scores, neg_inf)
        p = jax.nn.softmax(scores, axis=-1)
        ctx = jnp.einsum("bhqk,bhkd->bhqd", p, vh, precision=lax.Precision.HIGHEST)
        ctx = ctx.transpose(0, 2, 1, 3).reshape(B, S, D)
        sa = lin(ctx, layer["wo"], layer["bo"])
        x = _layer_norm(x + sa, layer["ln1_g"], layer["ln1_b"])
        h1 = _gelu(lin(x, layer["w1"], layer["b1"]))
        ffn = lin(h1, layer["w2"], layer["b2"])
        x = _layer_norm(x + ffn, layer["ln2_g"], layer["ln2_b"])
    return x[:, 0, :]


# ----------------------------------- main -------------------------------------

if __name__ == "__main__":
    # Small DistilBERT-style config (default would be dim=768, 12 heads, 6 layers)
    vocab_size, max_pos = 50, 64
    dim, hidden_dim, n_heads, n_layers = 32, 64, 4, 2
    batch, seq = 4, 8

    key = jax.random.PRNGKey(0)
    pkey, ikey = jax.random.split(key)
    params = init_params(pkey, vocab_size, max_pos, dim, hidden_dim, n_layers)

    input_ids = jax.random.randint(ikey, (batch, seq), 1, vocab_size, dtype=jnp.int32)
    # pad the tail of some sequences with padding_value = 0 (like HF batches)
    input_ids = input_ids.at[0, 5:].set(0)
    input_ids = input_ids.at[1, 7:].set(0)
    input_ids = input_ids.at[3, 3:].set(0)

    out = text_encoder_forward(input_ids, params, n_heads)
    out = jax.block_until_ready(out)
    assert out.shape == (batch, dim)

    ref = reference_forward(input_ids, params, n_heads)
    max_err = float(jnp.max(jnp.abs(out - ref)))
    # bf16 MXU operands vs. f32-HIGHEST reference -> slightly looser tolerance
    assert jnp.allclose(out, ref, atol=2e-2, rtol=2e-2), f"max_err={max_err}"

    print("KERNEL_OK")
</pallas_src>

<mosaic_0001>
module attributes {stable_mosaic.version = 11 : i64} {
  func.func @_encoder_kernel(%arg0: i32, %arg1: i32, %arg2: memref<2x8x32xf32, #tpu.memory_space<vmem>>, %arg3: memref<2x1x8xf32, #tpu.memory_space<vmem>>, %arg4: memref<1x32xf32, #tpu.memory_space<vmem>>, %arg5: memref<1x32xf32, #tpu.memory_space<vmem>>, %arg6: memref<1x32x96xbf16, #tpu.memory_space<vmem>>, %arg7: memref<1x1x96xf32, #tpu.memory_space<vmem>>, %arg8: memref<1x4x8x32xbf16, #tpu.memory_space<vmem>>, %arg9: memref<1x1x32xf32, #tpu.memory_space<vmem>>, %arg10: memref<1x1x32xf32, #tpu.memory_space<vmem>>, %arg11: memref<1x1x32xf32, #tpu.memory_space<vmem>>, %arg12: memref<1x32x64xbf16, #tpu.memory_space<vmem>>, %arg13: memref<1x1x64xf32, #tpu.memory_space<vmem>>, %arg14: memref<1x64x32xbf16, #tpu.memory_space<vmem>>, %arg15: memref<1x1x32xf32, #tpu.memory_space<vmem>>, %arg16: memref<1x1x32xf32, #tpu.memory_space<vmem>>, %arg17: memref<1x1x32xf32, #tpu.memory_space<vmem>>, %arg18: memref<2x1x32xf32, #tpu.memory_space<vmem>>, %arg19: memref<16x32xf32, #tpu.memory_space<vmem>>, %arg20: memref<16x32xf32, #tpu.memory_space<vmem>>) attributes {dimension_semantics = [#tpu.dimension_semantics<parallel>, #tpu.dimension_semantics<arbitrary>], iteration_bounds = array<i64: 2, 2>, scalar_prefetch = 0 : i64, scratch_operands = 2 : i64, tpu.core_type = #tpu.core_type<tc>, window_params = [{transform_indices = @transform_0, window_bounds = array<i64: 2, 8, 32>}, {transform_indices = @transform_1, window_bounds = array<i64: 2, 1, 8>}, {pipeline_mode = #tpu.pipeline_mode<synchronous>, transform_indices = @transform_2, window_bounds = array<i64: 1, 32>}, {pipeline_mode = #tpu.pipeline_mode<synchronous>, transform_indices = @transform_3, window_bounds = array<i64: 1, 32>}, {transform_indices = @transform_4, window_bounds = array<i64: 1, 32, 96>}, {transform_indices = @transform_5, window_bounds = array<i64: 1, 1, 96>}, {transform_indices = @transform_6, window_bounds = array<i64: 1, 4, 8, 32>}, {transform_indices = @transform_7, window_bounds = array<i64: 1, 1, 32>}, {transform_indices = @transform_8, window_bounds = array<i64: 1, 1, 32>}, {transform_indices = @transform_9, window_bounds = array<i64: 1, 1, 32>}, {transform_indices = @transform_10, window_bounds = array<i64: 1, 32, 64>}, {transform_indices = @transform_11, window_bounds = array<i64: 1, 1, 64>}, {transform_indices = @transform_12, window_bounds = array<i64: 1, 64, 32>}, {transform_indices = @transform_13, window_bounds = array<i64: 1, 1, 32>}, {transform_indices = @transform_14, window_bounds = array<i64: 1, 1, 32>}, {transform_indices = @transform_15, window_bounds = array<i64: 1, 1, 32>}, {transform_indices = @transform_16, window_bounds = array<i64: 2, 1, 32>}]} {
    %c0_i32 = arith.constant 0 : i32
    %0 = arith.cmpi eq, %arg1, %c0_i32 : i32
    %1 = arith.extui %0 : i1 to i32
    %c0_i32_0 = arith.constant 0 : i32
    %2 = arith.cmpi ne, %1, %c0_i32_0 : i32
    scf.if %2 {
      %c0_111 = arith.constant 0 : index
      %c0_112 = arith.constant 0 : index
      %c0_113 = arith.constant 0 : index
      %208 = vector.load %arg2[%c0_111, %c0_112, %c0_113] : memref<2x8x32xf32, #tpu.memory_space<vmem>>, vector<2x8x32xf32>
      %c0_114 = arith.constant 0 : index
      %c0_115 = arith.constant 0 : index
      %209 = vector.load %arg4[%c0_114, %c0_115] : memref<1x32xf32, #tpu.memory_space<vmem>>, vector<1x32xf32>
      %c0_116 = arith.constant 0 : index
      %c0_117 = arith.constant 0 : index
      %210 = vector.load %arg5[%c0_116, %c0_117] : memref<1x32xf32, #tpu.memory_space<vmem>>, vector<1x32xf32>
      %cst_118 = arith.constant dense<0.000000e+00> : vector<2x8xf32>
      %211 = vector.multi_reduction <add>, %208, %cst_118 [2] : vector<2x8x32xf32> to vector<2x8xf32>
      %212 = vector.shape_cast %211 : vector<2x8xf32> to vector<2x8x1xf32>
      %cst_119 = arith.constant 3.200000e+01 : f32
      %213 = vector.broadcast %cst_119 : f32 to vector<2x8x1xf32>
      %214 = arith.divf %212, %213 : vector<2x8x1xf32>
      %215 = vector.broadcast %214 : vector<2x8x1xf32> to vector<2x8x32xf32>
      %216 = arith.subf %208, %215 : vector<2x8x32xf32>
      %217 = arith.mulf %216, %216 : vector<2x8x32xf32>
      %cst_120 = arith.constant dense<0.000000e+00> : vector<2x8xf32>
      %218 = vector.multi_reduction <add>, %217, %cst_120 [2] : vector<2x8x32xf32> to vector<2x8xf32>
      %219 = vector.shape_cast %218 : vector<2x8xf32> to vector<2x8x1xf32>
      %cst_121 = arith.constant 3.200000e+01 : f32
      %220 = vector.broadcast %cst_121 : f32 to vector<2x8x1xf32>
      %221 = arith.divf %219, %220 : vector<2x8x1xf32>
      %222 = vector.broadcast %214 : vector<2x8x1xf32> to vector<2x8x32xf32>
      %223 = arith.subf %208, %222 : vector<2x8x32xf32>
      %cst_122 = arith.constant 9.99999996E-13 : f32
      %224 = vector.broadcast %cst_122 : f32 to vector<2x8x1xf32>
      %225 = arith.addf %221, %224 : vector<2x8x1xf32>
      %226 = math.rsqrt %225 : vector<2x8x1xf32>
      %227 = vector.broadcast %226 : vector<2x8x1xf32> to vector<2x8x32xf32>
      %228 = arith.mulf %223, %227 : vector<2x8x32xf32>
      %229 = vector.shape_cast %209 : vector<1x32xf32> to vector<1x1x32xf32>
      %230 = vector.broadcast %229 : vector<1x1x32xf32> to vector<2x8x32xf32>
      %231 = arith.mulf %228, %230 : vector<2x8x32xf32>
      %232 = vector.shape_cast %210 : vector<1x32xf32> to vector<1x1x32xf32>
      %233 = vector.broadcast %232 : vector<1x1x32xf32> to vector<2x8x32xf32>
      %234 = arith.addf %231, %233 : vector<2x8x32xf32>
      %235 = vector.shape_cast %234 : vector<2x8x32xf32> to vector<16x32xf32>
      %c0_123 = arith.constant 0 : index
      %c0_124 = arith.constant 0 : index
      %236 = vector.load %arg19[%c0_123, %c0_124] : memref<16x32xf32, #tpu.memory_space<vmem>>, vector<16x32xf32>
      tpu.vector_store %arg19[%c0_123, %c0_124], %235 {strides = array<i32>} : memref<16x32xf32, #tpu.memory_space<vmem>>, vector<16x32xf32>,
    } else {
    }
    %c0 = arith.constant 0 : index
    %c0_1 = arith.constant 0 : index
    %3 = vector.load %arg19[%c0, %c0_1] : memref<16x32xf32, #tpu.memory_space<vmem>>, vector<16x32xf32>
    %4 = arith.truncf %3 : vector<16x32xf32> to vector<16x32xbf16>
    %c0_2 = arith.constant 0 : index
    %c0_3 = arith.constant 0 : index
    %c0_4 = arith.constant 0 : index
    %5 = vector.load %arg6[%c0_2, %c0_3, %c0_4] : memref<1x32x96xbf16, #tpu.memory_space<vmem>>, vector<1x32x96xbf16>
    %6 = vector.shape_cast %5 : vector<1x32x96xbf16> to vector<32x96xbf16>
    %cst = arith.constant dense<0.000000e+00> : vector<16x96xf32>
    %7 = tpu.matmul %4, %6, %cst {dimension_numbers = #tpu.dot_dimension_numbers<[1], [0], [0], [1], [0, 0, 1, 1], [], []>} : vector<16x32xbf16>, vector<32x96xbf16>, vector<16x96xf32> -> vector<16x96xf32>
    %c0_5 = arith.constant 0 : index
    %c0_6 = arith.constant 0 : index
    %c0_7 = arith.constant 0 : index
    %8 = vector.load %arg7[%c0_5, %c0_6, %c0_7] : memref<1x1x96xf32, #tpu.memory_space<vmem>>, vector<1x1x96xf32>
    %9 = vector.shape_cast %8 : vector<1x1x96xf32> to vector<1x96xf32>
    %10 = vector.broadcast %9 : vector<1x96xf32> to vector<16x96xf32>
    %11 = arith.addf %7, %10 : vector<16x96xf32>
    %12 = arith.truncf %11 : vector<16x96xf32> to vector<16x96xbf16>
    %13 = vector.shape_cast %12 : vector<16x96xbf16> to vector<2x8x96xbf16>
    %c0_8 = arith.constant 0 : index
    %c0_9 = arith.constant 0 : index
    %c0_10 = arith.constant 0 : index
    %14 = vector.load %arg3[%c0_8, %c0_9, %c0_10] : memref<2x1x8xf32, #tpu.memory_space<vmem>>, vector<2x1x8xf32>
    %15 = vector.shape_cast %14 : vector<2x1x8xf32> to vector<2x1x8xf32>
    %16 = vector.broadcast %15 : vector<2x1x8xf32> to vector<2x8x8xf32>
    %cst_11 = arith.constant 0.000000e+00 : f32
    %17 = vector.broadcast %cst_11 : f32 to vector<16x32xf32>
    %c0_12 = arith.constant 0 : index
    %c0_13 = arith.constant 0 : index
    %18 = vector.load %arg20[%c0_12, %c0_13] : memref<16x32xf32, #tpu.memory_space<vmem>>, vector<16x32xf32>
    tpu.vector_store %arg20[%c0_12, %c0_13], %17 {strides = array<i32>} : memref<16x32xf32, #tpu.memory_space<vmem>>, vector<16x32xf32>,
    %19 = vector.extract_strided_slice %13 {offsets = [0, 0, 0], sizes = [2, 8, 8], strides = [1, 1, 1]} : vector<2x8x96xbf16> to vector<2x8x8xbf16>
    %20 = vector.extract_strided_slice %13 {offsets = [0, 0, 32], sizes = [2, 8, 8], strides = [1, 1, 1]} : vector<2x8x96xbf16> to vector<2x8x8xbf16>
    %21 = vector.extract_strided_slice %13 {offsets = [0, 0, 64], sizes = [2, 8, 8], strides = [1, 1, 1]} : vector<2x8x96xbf16> to vector<2x8x8xbf16>
    "tpu.trace_start"() <{level = 10 : i32, message = "bqd,bkd->bqk"}> : () -> ()
    %cst_14 = arith.constant dense<0.000000e+00> : vector<2x8x8xf32>
    %22 = tpu.matmul %19, %20, %cst_14 {dimension_numbers = #tpu.dot_dimension_numbers<[2], [2], [1], [1], [0, 0, 0, 1, 1, 1], [0], [0]>} : vector<2x8x8xbf16>, vector<2x8x8xbf16>, vector<2x8x8xf32> -> vector<2x8x8xf32>
    "tpu.trace_stop"() : () -> ()
    %23 = arith.addf %22, %16 : vector<2x8x8xf32>
    %cst_15 = arith.constant dense<0xFF800000> : vector<2x8xf32>
    %24 = vector.multi_reduction <maximumf>, %23, %cst_15 [2] : vector<2x8x8xf32> to vector<2x8xf32>
    %25 = vector.shape_cast %24 : vector<2x8xf32> to vector<2x8x1xf32>
    %26 = vector.broadcast %25 : vector<2x8x1xf32> to vector<2x8x8xf32>
    %27 = arith.subf %23, %26 : vector<2x8x8xf32>
    %28 = math.exp %27 : vector<2x8x8xf32>
    %cst_16 = arith.constant dense<0.000000e+00> : vector<2x8xf32>
    %29 = vector.multi_reduction <add>, %28, %cst_16 [2] : vector<2x8x8xf32> to vector<2x8xf32>
    %30 = vector.shape_cast %29 : vector<2x8xf32> to vector<2x8x1xf32>
    %31 = tpu.reciprocal %30 {approx = true} : vector<2x8x1xf32> -> vector<2x8x1xf32>
    %32 = vector.broadcast %31 : vector<2x8x1xf32> to vector<2x8x8xf32>
    %33 = arith.mulf %28, %32 : vector<2x8x8xf32>
    %34 = arith.truncf %33 : vector<2x8x8xf32> to vector<2x8x8xbf16>
    "tpu.trace_start"() <{level = 10 : i32, message = "bqk,bkd->bqd"}> : () -> ()
    %cst_17 = arith.constant dense<0.000000e+00> : vector<2x8x8xf32>
    %35 = tpu.matmul %34, %21, %cst_17 {dimension_numbers = #tpu.dot_dimension_numbers<[2], [1], [1], [2], [0, 0, 0, 1, 1, 2], [0], [0]>} : vector<2x8x8xbf16>, vector<2x8x8xbf16>, vector<2x8x8xf32> -> vector<2x8x8xf32>
    "tpu.trace_stop"() : () -> ()
    %c0_18 = arith.constant 0 : index
    %c0_19 = arith.constant 0 : index
    %36 = vector.load %arg20[%c0_18, %c0_19] : memref<16x32xf32, #tpu.memory_space<vmem>>, vector<16x32xf32>
    %37 = vector.shape_cast %35 : vector<2x8x8xf32> to vector<16x8xf32>
    %38 = arith.truncf %37 : vector<16x8xf32> to vector<16x8xbf16>
    %c0_20 = arith.constant 0 : index
    %c0_21 = arith.constant 0 : index
    %c0_22 = arith.constant 0 : index
    %c0_23 = arith.constant 0 : index
    %39 = vector.load %arg8[%c0_20, %c0_21, %c0_22, %c0_23] : memref<1x4x8x32xbf16, #tpu.memory_space<vmem>>, vector<1x1x8x32xbf16>
    %40 = vector.shape_cast %39 : vector<1x1x8x32xbf16> to vector<8x32xbf16>
    %cst_24 = arith.constant dense<0.000000e+00> : vector<16x32xf32>
    %41 = tpu.matmul %38, %40, %cst_24 {dimension_numbers = #tpu.dot_dimension_numbers<[1], [0], [0], [1], [0, 0, 1, 1], [], []>} : vector<16x8xbf16>, vector<8x32xbf16>, vector<16x32xf32> -> vector<16x32xf32>
    %42 = arith.addf %36, %41 : vector<16x32xf32>
    %c0_25 = arith.constant 0 : index
    %c0_26 = arith.constant 0 : index
    %43 = vector.load %arg20[%c0_25, %c0_26] : memref<16x32xf32, #tpu.memory_space<vmem>>, vector<16x32xf32>
    tpu.vector_store %arg20[%c0_25, %c0_26], %42 {strides = array<i32>} : memref<16x32xf32, #tpu.memory_space<vmem>>, vector<16x32xf32>,
    %44 = vector.extract_strided_slice %13 {offsets = [0, 0, 8], sizes = [2, 8, 8], strides = [1, 1, 1]} : vector<2x8x96xbf16> to vector<2x8x8xbf16>
    %45 = vector.extract_strided_slice %13 {offsets = [0, 0, 40], sizes = [2, 8, 8], strides = [1, 1, 1]} : vector<2x8x96xbf16> to vector<2x8x8xbf16>
    %46 = vector.extract_strided_slice %13 {offsets = [0, 0, 72], sizes = [2, 8, 8], strides = [1, 1, 1]} : vector<2x8x96xbf16> to vector<2x8x8xbf16>
    "tpu.trace_start"() <{level = 10 : i32, message = "bqd,bkd->bqk"}> : () -> ()
    %cst_27 = arith.constant dense<0.000000e+00> : vector<2x8x8xf32>
    %47 = tpu.matmul %44, %45, %cst_27 {dimension_numbers = #tpu.dot_dimension_numbers<[2], [2], [1], [1], [0, 0, 0, 1, 1, 1], [0], [0]>} : vector<2x8x8xbf16>, vector<2x8x8xbf16>, vector<2x8x8xf32> -> vector<2x8x8xf32>
    "tpu.trace_stop"() : () -> ()
    %48 = arith.addf %47, %16 : vector<2x8x8xf32>
    %cst_28 = arith.constant dense<0xFF800000> : vector<2x8xf32>
    %49 = vector.multi_reduction <maximumf>, %48, %cst_28 [2] : vector<2x8x8xf32> to vector<2x8xf32>
    %50 = vector.shape_cast %49 : vector<2x8xf32> to vector<2x8x1xf32>
    %51 = vector.broadcast %50 : vector<2x8x1xf32> to vector<2x8x8xf32>
    %52 = arith.subf %48, %51 : vector<2x8x8xf32>
    %53 = math.exp %52 : vector<2x8x8xf32>
    %cst_29 = arith.constant dense<0.000000e+00> : vector<2x8xf32>
    %54 = vector.multi_reduction <add>, %53, %cst_29 [2] : vector<2x8x8xf32> to vector<2x8xf32>
    %55 = vector.shape_cast %54 : vector<2x8xf32> to vector<2x8x1xf32>
    %56 = tpu.reciprocal %55 {approx = true} : vector<2x8x1xf32> -> vector<2x8x1xf32>
    %57 = vector.broadcast %56 : vector<2x8x1xf32> to vector<2x8x8xf32>
    %58 = arith.mulf %53, %57 : vector<2x8x8xf32>
    %59 = arith.truncf %58 : vector<2x8x8xf32> to vector<2x8x8xbf16>
    "tpu.trace_start"() <{level = 10 : i32, message = "bqk,bkd->bqd"}> : () -> ()
    %cst_30 = arith.constant dense<0.000000e+00> : vector<2x8x8xf32>
    %60 = tpu.matmul %59, %46, %cst_30 {dimension_numbers = #tpu.dot_dimension_numbers<[2], [1], [1], [2], [0, 0, 0, 1, 1, 2], [0], [0]>} : vector<2x8x8xbf16>, vector<2x8x8xbf16>, vector<2x8x8xf32> -> vector<2x8x8xf32>
    "tpu.trace_stop"() : () -> ()
    %c0_31 = arith.constant 0 : index
    %c0_32 = arith.constant 0 : index
    %61 = vector.load %arg20[%c0_31, %c0_32] : memref<16x32xf32, #tpu.memory_space<vmem>>, vector<16x32xf32>
    %62 = vector.shape_cast %60 : vector<2x8x8xf32> to vector<16x8xf32>
    %63 = arith.truncf %62 : vector<16x8xf32> to vector<16x8xbf16>
    %c0_33 = arith.constant 0 : index
    %c1 = arith.constant 1 : index
    %c0_34 = arith.constant 0 : index
    %c0_35 = arith.constant 0 : index
    %64 = vector.load %arg8[%c0_33, %c1, %c0_34, %c0_35] : memref<1x4x8x32xbf16, #tpu.memory_space<vmem>>, vector<1x1x8x32xbf16>
    %65 = vector.shape_cast %64 : vector<1x1x8x32xbf16> to vector<8x32xbf16>
    %cst_36 = arith.constant dense<0.000000e+00> : vector<16x32xf32>
    %66 = tpu.matmul %63, %65, %cst_36 {dimension_numbers = #tpu.dot_dimension_numbers<[1], [0], [0], [1], [0, 0, 1, 1], [], []>} : vector<16x8xbf16>, vector<8x32xbf16>, vector<16x32xf32> -> vector<16x32xf32>
    %67 = arith.addf %61, %66 : vector<16x32xf32>
    %c0_37 = arith.constant 0 : index
    %c0_38 = arith.constant 0 : index
    %68 = vector.load %arg20[%c0_37, %c0_38] : memref<16x32xf32, #tpu.memory_space<vmem>>, vector<16x32xf32>
    tpu.vector_store %arg20[%c0_37, %c0_38], %67 {strides = array<i32>} : memref<16x32xf32, #tpu.memory_space<vmem>>, vector<16x32xf32>,
    %69 = vector.extract_strided_slice %13 {offsets = [0, 0, 16], sizes = [2, 8, 8], strides = [1, 1, 1]} : vector<2x8x96xbf16> to vector<2x8x8xbf16>
    %70 = vector.extract_strided_slice %13 {offsets = [0, 0, 48], sizes = [2, 8, 8], strides = [1, 1, 1]} : vector<2x8x96xbf16> to vector<2x8x8xbf16>
    %71 = vector.extract_strided_slice %13 {offsets = [0, 0, 80], sizes = [2, 8, 8], strides = [1, 1, 1]} : vector<2x8x96xbf16> to vector<2x8x8xbf16>
    "tpu.trace_start"() <{level = 10 : i32, message = "bqd,bkd->bqk"}> : () -> ()
    %cst_39 = arith.constant dense<0.000000e+00> : vector<2x8x8xf32>
    %72 = tpu.matmul %69, %70, %cst_39 {dimension_numbers = #tpu.dot_dimension_numbers<[2], [2], [1], [1], [0, 0, 0, 1, 1, 1], [0], [0]>} : vector<2x8x8xbf16>, vector<2x8x8xbf16>, vector<2x8x8xf32> -> vector<2x8x8xf32>
    "tpu.trace_stop"() : () -> ()
    %73 = arith.addf %72, %16 : vector<2x8x8xf32>
    %cst_40 = arith.constant dense<0xFF800000> : vector<2x8xf32>
    %74 = vector.multi_reduction <maximumf>, %73, %cst_40 [2] : vector<2x8x8xf32> to vector<2x8xf32>
    %75 = vector.shape_cast %74 : vector<2x8xf32> to vector<2x8x1xf32>
    %76 = vector.broadcast %75 : vector<2x8x1xf32> to vector<2x8x8xf32>
    %77 = arith.subf %73, %76 : vector<2x8x8xf32>
    %78 = math.exp %77 : vector<2x8x8xf32>
    %cst_41 = arith.constant dense<0.000000e+00> : vector<2x8xf32>
    %79 = vector.multi_reduction <add>, %78, %cst_41 [2] : vector<2x8x8xf32> to vector<2x8xf32>
    %80 = vector.shape_cast %79 : vector<2x8xf32> to vector<2x8x1xf32>
    %81 = tpu.reciprocal %80 {approx = true} : vector<2x8x1xf32> -> vector<2x8x1xf32>
    %82 = vector.broadcast %81 : vector<2x8x1xf32> to vector<2x8x8xf32>
    %83 = arith.mulf %78, %82 : vector<2x8x8xf32>
    %84 = arith.truncf %83 : vector<2x8x8xf32> to vector<2x8x8xbf16>
    "tpu.trace_start"() <{level = 10 : i32, message = "bqk,bkd->bqd"}> : () -> ()
    %cst_42 = arith.constant dense<0.000000e+00> : vector<2x8x8xf32>
    %85 = tpu.matmul %84, %71, %cst_42 {dimension_numbers = #tpu.dot_dimension_numbers<[2], [1], [1], [2], [0, 0, 0, 1, 1, 2], [0], [0]>} : vector<2x8x8xbf16>, vector<2x8x8xbf16>, vector<2x8x8xf32> -> vector<2x8x8xf32>
    "tpu.trace_stop"() : () -> ()
    %c0_43 = arith.constant 0 : index
    %c0_44 = arith.constant 0 : index
    %86 = vector.load %arg20[%c0_43, %c0_44] : memref<16x32xf32, #tpu.memory_space<vmem>>, vector<16x32xf32>
    %87 = vector.shape_cast %85 : vector<2x8x8xf32> to vector<16x8xf32>
    %88 = arith.truncf %87 : vector<16x8xf32> to vector<16x8xbf16>
    %c0_45 = arith.constant 0 : index
    %c2 = arith.constant 2 : index
    %c0_46 = arith.constant 0 : index
    %c0_47 = arith.constant 0 : index
    %89 = vector.load %arg8[%c0_45, %c2, %c0_46, %c0_47] : memref<1x4x8x32xbf16, #tpu.memory_space<vmem>>, vector<1x1x8x32xbf16>
    %90 = vector.shape_cast %89 : vector<1x1x8x32xbf16> to vector<8x32xbf16>
    %cst_48 = arith.constant dense<0.000000e+00> : vector<16x32xf32>
    %91 = tpu.matmul %88, %90, %cst_48 {dimension_numbers = #tpu.dot_dimension_numbers<[1], [0], [0], [1], [0, 0, 1, 1], [], []>} : vector<16x8xbf16>, vector<8x32xbf16>, vector<16x32xf32> -> vector<16x32xf32>
    %92 = arith.addf %86, %91 : vector<16x32xf32>
    %c0_49 = arith.constant 0 : index
    %c0_50 = arith.constant 0 : index
    %93 = vector.load %arg20[%c0_49, %c0_50] : memref<16x32xf32, #tpu.memory_space<vmem>>, vector<16x32xf32>
    tpu.vector_store %arg20[%c0_49, %c0_50], %92 {strides = array<i32>} : memref<16x32xf32, #tpu.memory_space<vmem>>, vector<16x32xf32>,
    %94 = vector.extract_strided_slice %13 {offsets = [0, 0, 24], sizes = [2, 8, 8], strides = [1, 1, 1]} : vector<2x8x96xbf16> to vector<2x8x8xbf16>
    %95 = vector.extract_strided_slice %13 {offsets = [0, 0, 56], sizes = [2, 8, 8], strides = [1, 1, 1]} : vector<2x8x96xbf16> to vector<2x8x8xbf16>
    %96 = vector.extract_strided_slice %13 {offsets = [0, 0, 88], sizes = [2, 8, 8], strides = [1, 1, 1]} : vector<2x8x96xbf16> to vector<2x8x8xbf16>
    "tpu.trace_start"() <{level = 10 : i32, message = "bqd,bkd->bqk"}> : () -> ()
    %cst_51 = arith.constant dense<0.000000e+00> : vector<2x8x8xf32>
    %97 = tpu.matmul %94, %95, %cst_51 {dimension_numbers = #tpu.dot_dimension_numbers<[2], [2], [1], [1], [0, 0, 0, 1, 1, 1], [0], [0]>} : vector<2x8x8xbf16>, vector<2x8x8xbf16>, vector<2x8x8xf32> -> vector<2x8x8xf32>
    "tpu.trace_stop"() : () -> ()
    %98 = arith.addf %97, %16 : vector<2x8x8xf32>
    %cst_52 = arith.constant dense<0xFF800000> : vector<2x8xf32>
    %99 = vector.multi_reduction <maximumf>, %98, %cst_52 [2] : vector<2x8x8xf32> to vector<2x8xf32>
    %100 = vector.shape_cast %99 : vector<2x8xf32> to vector<2x8x1xf32>
    %101 = vector.broadcast %100 : vector<2x8x1xf32> to vector<2x8x8xf32>
    %102 = arith.subf %98, %101 : vector<2x8x8xf32>
    %103 = math.exp %102 : vector<2x8x8xf32>
    %cst_53 = arith.constant dense<0.000000e+00> : vector<2x8xf32>
    %104 = vector.multi_reduction <add>, %103, %cst_53 [2] : vector<2x8x8xf32> to vector<2x8xf32>
    %105 = vector.shape_cast %104 : vector<2x8xf32> to vector<2x8x1xf32>
    %106 = tpu.reciprocal %105 {approx = true} : vector<2x8x1xf32> -> vector<2x8x1xf32>
    %107 = vector.broadcast %106 : vector<2x8x1xf32> to vector<2x8x8xf32>
    %108 = arith.mulf %103, %107 : vector<2x8x8xf32>
    %109 = arith.truncf %108 : vector<2x8x8xf32> to vector<2x8x8xbf16>
    "tpu.trace_start"() <{level = 10 : i32, message = "bqk,bkd->bqd"}> : () -> ()
    %cst_54 = arith.constant dense<0.000000e+00> : vector<2x8x8xf32>
    %110 = tpu.matmul %109, %96, %cst_54 {dimension_numbers = #tpu.dot_dimension_numbers<[2], [1], [1], [2], [0, 0, 0, 1, 1, 2], [0], [0]>} : vector<2x8x8xbf16>, vector<2x8x8xbf16>, vector<2x8x8xf32> -> vector<2x8x8xf32>
    "tpu.trace_stop"() : () -> ()
    %c0_55 = arith.constant 0 : index
    %c0_56 = arith.constant 0 : index
    %111 = vector.load %arg20[%c0_55, %c0_56] : memref<16x32xf32, #tpu.memory_space<vmem>>, vector<16x32xf32>
    %112 = vector.shape_cast %110 : vector<2x8x8xf32> to vector<16x8xf32>
    %113 = arith.truncf %112 : vector<16x8xf32> to vector<16x8xbf16>
    %c0_57 = arith.constant 0 : index
    %c3 = arith.constant 3 : index
    %c0_58 = arith.constant 0 : index
    %c0_59 = arith.constant 0 : index
    %114 = vector.load %arg8[%c0_57, %c3, %c0_58, %c0_59] : memref<1x4x8x32xbf16, #tpu.memory_space<vmem>>, vector<1x1x8x32xbf16>
    %115 = vector.shape_cast %114 : vector<1x1x8x32xbf16> to vector<8x32xbf16>
    %cst_60 = arith.constant dense<0.000000e+00> : vector<16x32xf32>
    %116 = tpu.matmul %113, %115, %cst_60 {dimension_numbers = #tpu.dot_dimension_numbers<[1], [0], [0], [1], [0, 0, 1, 1], [], []>} : vector<16x8xbf16>, vector<8x32xbf16>, vector<16x32xf32> -> vector<16x32xf32>
    %117 = arith.addf %111, %116 : vector<16x32xf32>
    %c0_61 = arith.constant 0 : index
    %c0_62 = arith.constant 0 : index
    %118 = vector.load %arg20[%c0_61, %c0_62] : memref<16x32xf32, #tpu.memory_space<vmem>>, vector<16x32xf32>
    tpu.vector_store %arg20[%c0_61, %c0_62], %117 {strides = array<i32>} : memref<16x32xf32, #tpu.memory_space<vmem>>, vector<16x32xf32>,
    %c0_63 = arith.constant 0 : index
    %c0_64 = arith.constant 0 : index
    %119 = vector.load %arg20[%c0_63, %c0_64] : memref<16x32xf32, #tpu.memory_space<vmem>>, vector<16x32xf32>
    %120 = arith.addf %3, %119 : vector<16x32xf32>
    %c0_65 = arith.constant 0 : index
    %c0_66 = arith.constant 0 : index
    %c0_67 = arith.constant 0 : index
    %121 = vector.load %arg9[%c0_65, %c0_66, %c0_67] : memref<1x1x32xf32, #tpu.memory_space<vmem>>, vector<1x1x32xf32>
    %122 = vector.shape_cast %121 : vector<1x1x32xf32> to vector<1x32xf32>
    %123 = vector.broadcast %122 : vector<1x32xf32> to vector<16x32xf32>
    %124 = arith.addf %120, %123 : vector<16x32xf32>
    %c0_68 = arith.constant 0 : index
    %c0_69 = arith.constant 0 : index
    %c0_70 = arith.constant 0 : index
    %125 = vector.load %arg10[%c0_68, %c0_69, %c0_70] : memref<1x1x32xf32, #tpu.memory_space<vmem>>, vector<1x1x32xf32>
    %126 = vector.shape_cast %125 : vector<1x1x32xf32> to vector<1x32xf32>
    %c0_71 = arith.constant 0 : index
    %c0_72 = arith.constant 0 : index
    %c0_73 = arith.constant 0 : index
    %127 = vector.load %arg11[%c0_71, %c0_72, %c0_73] : memref<1x1x32xf32, #tpu.memory_space<vmem>>, vector<1x1x32xf32>
    %128 = vector.shape_cast %127 : vector<1x1x32xf32> to vector<1x32xf32>
    %cst_74 = arith.constant dense<0.000000e+00> : vector<16xf32>
    %129 = vector.multi_reduction <add>, %124, %cst_74 [1] : vector<16x32xf32> to vector<16xf32>
    %130 = vector.shape_cast %129 : vector<16xf32> to vector<16x1xf32>
    %cst_75 = arith.constant 3.200000e+01 : f32
    %131 = vector.broadcast %cst_75 : f32 to vector<16x1xf32>
    %132 = arith.divf %130, %131 : vector<16x1xf32>
    %133 = vector.broadcast %132 : vector<16x1xf32> to vector<16x32xf32>
    %134 = arith.subf %124, %133 : vector<16x32xf32>
    %135 = arith.mulf %134, %134 : vector<16x32xf32>
    %cst_76 = arith.constant dense<0.000000e+00> : vector<16xf32>
    %136 = vector.multi_reduction <add>, %135, %cst_76 [1] : vector<16x32xf32> to vector<16xf32>
    %137 = vector.shape_cast %136 : vector<16xf32> to vector<16x1xf32>
    %cst_77 = arith.constant 3.200000e+01 : f32
    %138 = vector.broadcast %cst_77 : f32 to vector<16x1xf32>
    %139 = arith.divf %137, %138 : vector<16x1xf32>
    %140 = vector.broadcast %132 : vector<16x1xf32> to vector<16x32xf32>
    %141 = arith.subf %124, %140 : vector<16x32xf32>
    %cst_78 = arith.constant 9.99999996E-13 : f32
    %142 = vector.broadcast %cst_78 : f32 to vector<16x1xf32>
    %143 = arith.addf %139, %142 : vector<16x1xf32>
    %144 = math.rsqrt %143 : vector<16x1xf32>
    %145 = vector.broadcast %144 : vector<16x1xf32> to vector<16x32xf32>
    %146 = arith.mulf %141, %145 : vector<16x32xf32>
    %147 = vector.broadcast %126 : vector<1x32xf32> to vector<16x32xf32>
    %148 = arith.mulf %146, %147 : vector<16x32xf32>
    %149 = vector.broadcast %128 : vector<1x32xf32> to vector<16x32xf32>
    %150 = arith.addf %148, %149 : vector<16x32xf32>
    %151 = arith.truncf %150 : vector<16x32xf32> to vector<16x32xbf16>
    %cst_79 = arith.constant 0.000000e+00 : f32
    %152 = vector.broadcast %cst_79 : f32 to vector<16x32xf32>
    %c0_80 = arith.constant 0 : index
    %c0_81 = arith.constant 0 : index
    %c0_82 = arith.constant 0 : index
    %153 = vector.load %arg12[%c0_80, %c0_81, %c0_82] : memref<1x32x64xbf16, #tpu.memory_space<vmem>>, vector<1x32x64xbf16>
    %154 = vector.shape_cast %153 : vector<1x32x64xbf16> to vector<32x64xbf16>
    %cst_83 = arith.constant dense<0.000000e+00> : vector<16x64xf32>
    %155 = tpu.matmul %151, %154, %cst_83 {dimension_numbers = #tpu.dot_dimension_numbers<[1], [0], [0], [1], [0, 0, 1, 1], [], []>} : vector<16x32xbf16>, vector<32x64xbf16>, vector<16x64xf32> -> vector<16x64xf32>
    %c0_84 = arith.constant 0 : index
    %c0_85 = arith.constant 0 : index
    %c0_86 = arith.constant 0 : index
    %156 = vector.load %arg13[%c0_84, %c0_85, %c0_86] : memref<1x1x64xf32, #tpu.memory_space<vmem>>, vector<1x1x64xf32>
    %157 = vector.shape_cast %156 : vector<1x1x64xf32> to vector<1x64xf32>
    %158 = vector.broadcast %157 : vector<1x64xf32> to vector<16x64xf32>
    %159 = arith.addf %155, %158 : vector<16x64xf32>
    %cst_87 = arith.constant 5.000000e-01 : f32
    %160 = vector.broadcast %cst_87 : f32 to vector<16x64xf32>
    %161 = arith.mulf %160, %159 : vector<16x64xf32>
    %cst_88 = arith.constant 0.707106769 : f32
    %162 = vector.broadcast %cst_88 : f32 to vector<16x64xf32>
    %163 = arith.mulf %159, %162 : vector<16x64xf32>
    %164 = math.erf %163 : vector<16x64xf32>
    %cst_89 = arith.constant 1.000000e+00 : f32
    %165 = vector.broadcast %cst_89 : f32 to vector<16x64xf32>
    %166 = arith.addf %165, %164 : vector<16x64xf32>
    %167 = arith.mulf %161, %166 : vector<16x64xf32>
    %168 = arith.truncf %167 : vector<16x64xf32> to vector<16x64xbf16>
    %c0_90 = arith.constant 0 : index
    %c0_91 = arith.constant 0 : index
    %c0_92 = arith.constant 0 : index
    %169 = vector.load %arg14[%c0_90, %c0_91, %c0_92] : memref<1x64x32xbf16, #tpu.memory_space<vmem>>, vector<1x64x32xbf16>
    %170 = vector.shape_cast %169 : vector<1x64x32xbf16> to vector<64x32xbf16>
    %cst_93 = arith.constant dense<0.000000e+00> : vector<16x32xf32>
    %171 = tpu.matmul %168, %170, %cst_93 {dimension_numbers = #tpu.dot_dimension_numbers<[1], [0], [0], [1], [0, 0, 1, 1], [], []>} : vector<16x64xbf16>, vector<64x32xbf16>, vector<16x32xf32> -> vector<16x32xf32>
    %172 = arith.addf %152, %171 : vector<16x32xf32>
    %173 = arith.addf %150, %172 : vector<16x32xf32>
    %c0_94 = arith.constant 0 : index
    %c0_95 = arith.constant 0 : index
    %c0_96 = arith.constant 0 : index
    %174 = vector.load %arg15[%c0_94, %c0_95, %c0_96] : memref<1x1x32xf32, #tpu.memory_space<vmem>>, vector<1x1x32xf32>
    %175 = vector.shape_cast %174 : vector<1x1x32xf32> to vector<1x32xf32>
    %176 = vector.broadcast %175 : vector<1x32xf32> to vector<16x32xf32>
    %177 = arith.addf %173, %176 : vector<16x32xf32>
    %c0_97 = arith.constant 0 : index
    %c0_98 = arith.constant 0 : index
    %c0_99 = arith.constant 0 : index
    %178 = vector.load %arg16[%c0_97, %c0_98, %c0_99] : memref<1x1x32xf32, #tpu.memory_space<vmem>>, vector<1x1x32xf32>
    %179 = vector.shape_cast %178 : vector<1x1x32xf32> to vector<1x32xf32>
    %c0_100 = arith.constant 0 : index
    %c0_101 = arith.constant 0 : index
    %c0_102 = arith.constant 0 : index
    %180 = vector.load %arg17[%c0_100, %c0_101, %c0_102] : memref<1x1x32xf32, #tpu.memory_space<vmem>>, vector<1x1x32xf32>
    %181 = vector.shape_cast %180 : vector<1x1x32xf32> to vector<1x32xf32>
    %cst_103 = arith.constant dense<0.000000e+00> : vector<16xf32>
    %182 = vector.multi_reduction <add>, %177, %cst_103 [1] : vector<16x32xf32> to vector<16xf32>
    %183 = vector.shape_cast %182 : vector<16xf32> to vector<16x1xf32>
    %cst_104 = arith.constant 3.200000e+01 : f32
    %184 = vector.broadcast %cst_104 : f32 to vector<16x1xf32>
    %185 = arith.divf %183, %184 : vector<16x1xf32>
    %186 = vector.broadcast %185 : vector<16x1xf32> to vector<16x32xf32>
    %187 = arith.subf %177, %186 : vector<16x32xf32>
    %188 = arith.mulf %187, %187 : vector<16x32xf32>
    %cst_105 = arith.constant dense<0.000000e+00> : vector<16xf32>
    %189 = vector.multi_reduction <add>, %188, %cst_105 [1] : vector<16x32xf32> to vector<16xf32>
    %190 = vector.shape_cast %189 : vector<16xf32> to vector<16x1xf32>
    %cst_106 = arith.constant 3.200000e+01 : f32
    %191 = vector.broadcast %cst_106 : f32 to vector<16x1xf32>
    %192 = arith.divf %190, %191 : vector<16x1xf32>
    %193 = vector.broadcast %185 : vector<16x1xf32> to vector<16x32xf32>
    %194 = arith.subf %177, %193 : vector<16x32xf32>
    %cst_107 = arith.constant 9.99999996E-13 : f32
    %195 = vector.broadcast %cst_107 : f32 to vector<16x1xf32>
    %196 = arith.addf %192, %195 : vector<16x1xf32>
    %197 = math.rsqrt %196 : vector<16x1xf32>
    %198 = vector.broadcast %197 : vector<16x1xf32> to vector<16x32xf32>
    %199 = arith.mulf %194, %198 : vector<16x32xf32>
    %200 = vector.broadcast %179 : vector<1x32xf32> to vector<16x32xf32>
    %201 = arith.mulf %199, %200 : vector<16x32xf32>
    %202 = vector.broadcast %181 : vector<1x32xf32> to vector<16x32xf32>
    %203 = arith.addf %201, %202 : vector<16x32xf32>
    %c0_108 = arith.constant 0 : index
    %c0_109 = arith.constant 0 : index
    %204 = vector.load %arg19[%c0_108, %c0_109] : memref<16x32xf32, #tpu.memory_space<vmem>>, vector<16x32xf32>
    tpu.vector_store %arg19[%c0_108, %c0_109], %203 {strides = array<i32>} : memref<16x32xf32, #tpu.memory_space<vmem>>, vector<16x32xf32>,
    %c1_i32 = arith.constant 1 : i32
    %205 = arith.cmpi eq, %arg1, %c1_i32 : i32
    %206 = arith.extui %205 : i1 to i32
    %c0_i32_110 = arith.constant 0 : i32
    %207 = arith.cmpi ne, %206, %c0_i32_110 : i32
    scf.if %207 {
      %208 = vector.shape_cast %203 : vector<16x32xf32> to vector<2x8x32xf32>
      %209 = vector.extract_strided_slice %208 {offsets = [0, 0, 0], sizes = [2, 1, 32], strides = [1, 1, 1]} : vector<2x8x32xf32> to vector<2x1x32xf32>
      %c0_111 = arith.constant 0 : index
      %c0_112 = arith.constant 0 : index
      %c0_113 = arith.constant 0 : index
      %210 = vector.load %arg18[%c0_111, %c0_112, %c0_113] : memref<2x1x32xf32, #tpu.memory_space<vmem>>, vector<2x1x32xf32>
      tpu.vector_store %arg18[%c0_111, %c0_112, %c0_113], %209 {strides = array<i32>} : memref<2x1x32xf32, #tpu.memory_space<vmem>>, vector<2x1x32xf32>,
    } else {
    }
    return
  }
  func.func @transform_0(%arg0: i32, %arg1: i32) -> (i32, i32, i32) {
    %c0_i32 = arith.constant 0 : i32
    %c0_i32_0 = arith.constant 0 : i32
    %c0_i32_1 = arith.constant 0 : i32
    return %arg0, %c0_i32, %c0_i32_0 : i32, i32, i32
  }
  func.func @transform_1(%arg0: i32, %arg1: i32) -> (i32, i32, i32) {
    %c0_i32 = arith.constant 0 : i32
    %c0_i32_0 = arith.constant 0 : i32
    %c0_i32_1 = arith.constant 0 : i32
    return %arg0, %c0_i32, %c0_i32_0 : i32, i32, i32
  }
  func.func @transform_2(%arg0: i32, %arg1: i32) -> (i32, i32) {
    %c0_i32 = arith.constant 0 : i32
    %c0_i32_0 = arith.constant 0 : i32
    %c0_i32_1 = arith.constant 0 : i32
    return %c0_i32, %c0_i32_0 : i32, i32
  }
  func.func @transform_3(%arg0: i32, %arg1: i32) -> (i32, i32) {
    %c0_i32 = arith.constant 0 : i32
    %c0_i32_0 = arith.constant 0 : i32
    %c0_i32_1 = arith.constant 0 : i32
    return %c0_i32, %c0_i32_0 : i32, i32
  }
  func.func @transform_4(%arg0: i32, %arg1: i32) -> (i32, i32, i32) {
    %c0_i32 = arith.constant 0 : i32
    %c0_i32_0 = arith.constant 0 : i32
    %c0_i32_1 = arith.constant 0 : i32
    return %arg1, %c0_i32, %c0_i32_0 : i32, i32, i32
  }
  func.func @transform_5(%arg0: i32, %arg1: i32) -> (i32, i32, i32) {
    %c0_i32 = arith.constant 0 : i32
    %c0_i32_0 = arith.constant 0 : i32
    %c0_i32_1 = arith.constant 0 : i32
    return %arg1, %c0_i32, %c0_i32_0 : i32, i32, i32
  }
  func.func @transform_6(%arg0: i32, %arg1: i32) -> (i32, i32, i32, i32) {
    %c0_i32 = arith.constant 0 : i32
    %c0_i32_0 = arith.constant 0 : i32
    %c0_i32_1 = arith.constant 0 : i32
    %c0_i32_2 = arith.constant 0 : i32
    return %arg1, %c0_i32, %c0_i32_0, %c0_i32_1 : i32, i32, i32, i32
  }
  func.func @transform_7(%arg0: i32, %arg1: i32) -> (i32, i32, i32) {
    %c0_i32 = arith.constant 0 : i32
    %c0_i32_0 = arith.constant 0 : i32
    %c0_i32_1 = arith.constant 0 : i32
    return %arg1, %c0_i32, %c0_i32_0 : i32, i32, i32
  }
  func.func @transform_8(%arg0: i32, %arg1: i32) -> (i32, i32, i32) {
    %c0_i32 = arith.constant 0 : i32
    %c0_i32_0 = arith.constant 0 : i32
    %c0_i32_1 = arith.constant 0 : i32
    return %arg1, %c0_i32, %c0_i32_0 : i32, i32, i32
  }
  func.func @transform_9(%arg0: i32, %arg1: i32) -> (i32, i32, i32) {
    %c0_i32 = arith.constant 0 : i32
    %c0_i32_0 = arith.constant 0 : i32
    %c0_i32_1 = arith.constant 0 : i32
    return %arg1, %c0_i32, %c0_i32_0 : i32, i32, i32
  }
  func.func @transform_10(%arg0: i32, %arg1: i32) -> (i32, i32, i32) {
    %c0_i32 = arith.constant 0 : i32
    %c0_i32_0 = arith.constant 0 : i32
    %c0_i32_1 = arith.constant 0 : i32
    return %arg1, %c0_i32, %c0_i32_0 : i32, i32, i32
  }
  func.func @transform_11(%arg0: i32, %arg1: i32) -> (i32, i32, i32) {
    %c0_i32 = arith.constant 0 : i32
    %c0_i32_0 = arith.constant 0 : i32
    %c0_i32_1 = arith.constant 0 : i32
    return %arg1, %c0_i32, %c0_i32_0 : i32, i32, i32
  }
  func.func @transform_12(%arg0: i32, %arg1: i32) -> (i32, i32, i32) {
    %c0_i32 = arith.constant 0 : i32
    %c0_i32_0 = arith.constant 0 : i32
    %c0_i32_1 = arith.constant 0 : i32
    return %arg1, %c0_i32, %c0_i32_0 : i32, i32, i32
  }
  func.func @transform_13(%arg0: i32, %arg1: i32) -> (i32, i32, i32) {
    %c0_i32 = arith.constant 0 : i32
    %c0_i32_0 = arith.constant 0 : i32
    %c0_i32_1 = arith.constant 0 : i32
    return %arg1, %c0_i32, %c0_i32_0 : i32, i32, i32
  }
  func.func @transform_14(%arg0: i32, %arg1: i32) -> (i32, i32, i32) {
    %c0_i32 = arith.constant 0 : i32
    %c0_i32_0 = arith.constant 0 : i32
    %c0_i32_1 = arith.constant 0 : i32
    return %arg1, %c0_i32, %c0_i32_0 : i32, i32, i32
  }
  func.func @transform_15(%arg0: i32, %arg1: i32) -> (i32, i32, i32) {
    %c0_i32 = arith.constant 0 : i32
    %c0_i32_0 = arith.constant 0 : i32
    %c0_i32_1 = arith.constant 0 : i32
    return %arg1, %c0_i32, %c0_i32_0 : i32, i32, i32
  }
  func.func @transform_16(%arg0: i32, %arg1: i32) -> (i32, i32, i32) {
    %c0_i32 = arith.constant 0 : i32
    %c0_i32_0 = arith.constant 0 : i32
    %c0_i32_1 = arith.constant 0 : i32
    return %arg0, %c0_i32, %c0_i32_0 : i32, i32, i32
  }
}

</mosaic_0001>

<bundles_post_ra>
// kernel: tpu_custom_call.1
= control target key start
LH: loop header
LB: loop body
LE: loop exit
PB: predicated region body
PF: predicated region fallthrough
CT: control target
= control target key end

     0   :  { %s4052_s0 = inlined_call_operand.vmem [shape: f32[4,8,32], index: 0, kind: input, shape index: {}]   ;;  %s4053_s1 = inlined_call_operand.hbm [shape: f32[4,1,8], index: 1, kind: input, shape index: {}]   ;;  %s4054_s2 = inlined_call_operand.hbm [shape: f32[1,32], index: 2, kind: input, shape index: {}]   ;;  %s4055_s3 = inlined_call_operand.hbm [shape: f32[1,32], index: 3, kind: input, shape index: {}]   ;;  %s4056_s4 = inlined_call_operand.vmem [shape: bf16[2,32,96], index: 4, kind: input, shape index: {}]   ;;  %s4057_s5 = inlined_call_operand.vmem [shape: f32[2,1,96], index: 5, kind: input, shape index: {}]   ;;  %s4058_s6 = inlined_call_operand.vmem [shape: bf16[2,4,8,32], index: 6, kind: input, shape index: {}]   ;;  %s4059_s7 = inlined_call_operand.vmem [shape: f32[2,1,32], index: 7, kind: input, shape index: {}]   ;;  %s4060_s8 = inlined_call_operand.vmem [shape: f32[2,1,32], index: 8, kind: input, shape index: {}]   ;;  %s4061_s9 = inlined_call_operand.vmem [shape: f32[2,1,32], index: 9, kind: input, shape index: {}]   ;;  %s4062_s10 = inlined_call_operand.hbm [shape: bf16[2,32,64], index: 10, kind: input, shape index: {}]   ;;  %s4063_s11 = inlined_call_operand.vmem [shape: f32[2,1,64], index: 11, kind: input, shape index: {}]   ;;  %s4064_s12 = inlined_call_operand.vmem [shape: bf16[2,64,32], index: 12, kind: input, shape index: {}]   ;;  %s4065_s13 = inlined_call_operand.vmem [shape: f32[2,1,32], index: 13, kind: input, shape index: {}]   ;;  %s4066_s14 = inlined_call_operand.vmem [shape: f32[2,1,32], index: 14, kind: input, shape index: {}]   ;;  %s4067_s15 = inlined_call_operand.vmem [shape: f32[2,1,32], index: 15, kind: input, shape index: {}]   ;;  %s4068_s16 = inlined_call_operand.hbm [shape: f32[4,1,32], index: 16, kind: output, shape index: {}]  }
   0x1   :  { %4090 = sst [smem:[#allocation31_spill]] %s4052_s0 }
   0x2   :  { %4091 = sst [smem:[#allocation32_spill]] %s4053_s1 }
   0x3   :  { %4092 = sst [smem:[#allocation33_spill]] %s4054_s2 }
   0x4   :  { %4093 = sst [smem:[#allocation34_spill]] %s4055_s3 }
   0x5   :  { %4094 = sst [smem:[#allocation35_spill]] %s4056_s4 }
   0x6   :  { %4095 = sst [smem:[#allocation36_spill]] %s4058_s6 }
   0x7   :  { %4096 = sst [smem:[#allocation37_spill]] %s4059_s7 }
   0x8   :  { %4097 = sst [smem:[#allocation38_spill]] %s4060_s8 }
   0x9   :  { %4098 = sst [smem:[#allocation39_spill]] %s4061_s9 }
   0xa   :  { %4099 = sst [smem:[#allocation40_spill]] %s4062_s10 }
   0xb   :  { %4100 = sst [smem:[#allocation41_spill]] %s4063_s11 }
   0xc   :  { %4101 = sst [smem:[#allocation42_spill]] %s4064_s12 }
   0xd   :  { %4102 = sst [smem:[#allocation43_spill]] %s4065_s13 }
   0xe   :  { %4103 = sst [smem:[#allocation44_spill]] %s4066_s14 }
   0xf   :  { %4104 = sst [smem:[#allocation45_spill]] %s4067_s15 }
  0x10   :  { %4105 = sst [smem:[#allocation46_spill]] %s4068_s16 }
  0x11   :  { %21 = vsyncpa [#allocation5], 0 }
  0x12   :  { %23 = vsyncpa [#allocation5 + $0x1], 0 }
  0x13   :  { %24 = vsyncpa [#allocation8], 0 }
  0x14   :  { %25 = vsyncpa [#allocation11], 0 }
  0x15   :  { %27 = vsyncpa [#allocation11 + $0x1], 0 }
  0x16   :  { %28 = vsyncpa [#allocation6], 0 }
  0x17   :  { %30 = vsyncpa [#allocation6 + $0x1], 0  ;;  %s3438_s21 = smov 0   ;;  %s3440_s22 = smov 0  }
  0x18   :  { %s3442_s23 = smov 0   ;;  %s3444_s24 = smov 0  }
  0x19   :  { %s3446_s25 = smov 0   ;;  %s3448_s26 = smov 0  }
  0x1a   :  { %s3450_s27 = smov 0   ;;  %s3452_s28 = smov 0  }
  0x1b   :  { %s3454_s29 = smov 0   ;;  %s3456_s30 = smov 0  }
  0x1c   :  { %s3458_s0 = smov 0  }
  0x1d LB: > { %4106 = sst [smem:[#allocation17_spill]] %s3291_s22  ;;  %s2600_s17 = sadd.s32 4294967295, %s3327_s0   ;;  %s3327_s0 = sphi %s3458_s0, %s36_s0   ;;  %s3323_s30 = sphi %s3456_s30, %s4182_s30   ;;  %s3319_s29 = sphi %s3454_s29, %s4181_s29   ;;  %s3315_s28 = sphi %s3452_s28, %s4180_s28   ;;  %s3311_s27 = sphi %s3450_s27, %s4179_s27   ;;  %s3307_s26 = sphi %s3448_s26, %s4178_s26   ;;  %s3303_s25 = sphi %s3446_s25, %s4177_s25   ;;  %s3299_s24 = sphi %s3444_s24, %s4176_s24   ;;  %s3295_s23 = sphi %s3442_s23, %s4175_s23   ;;  %s3291_s22 = sphi %s3440_s22, %s4174_s22   ;;  %s3287_s21 = sphi %s3438_s21, %s4173_s21  }
  0x1e   : > { %4107 = sst [smem:[#allocation18_spill]] %s3295_s23  ;;  %s2601_s18 = sadd.s32 4294967294, %s3327_s0  }
  0x1f   : > { %4108 = sst [smem:[#allocation19_spill]] %s3299_s24  ;;  %p94_p0 = scmp.ne.s32.totalorder %s3303_s25, %s3299_s24 }
  0x20   : > { %4109 = sst [smem:[#allocation20_spill]] %s3303_s25  ;;  %p3495_p1 = scmp.eq.s32.totalorder %s2600_s17, 0 }
  0x21   : > { %4110 = sst [smem:[#allocation21_spill]] %s3307_s26  ;;  %p318_p2 = scmp.ne.s32.totalorder %s3291_s22, %s3287_s21 }
  0x22   : > { %4111 = sst [smem:[#allocation22_spill]] %s3319_s29  ;;  %p3500_p3 = scmp.eq.s32.totalorder %s2600_s17, 3 }
  0x23   : > { %4112 = sst [smem:[#allocation23_spill]] %s3323_s30  ;;  %p3506_p4 = por %p3495_p1, %p94_p0 }
  0x24   : > { %4113 = sst [smem:[#allocation24_spill]] %s3327_s0  ;;  %p478_p5 = scmp.eq.s32.totalorder %s2601_s18, 3 }
  0x25   : > { %s4114_s19 = scalar_select %p3495_p1, 1, 0 }
  0x26   : > { %s4116_s16 = scalar_select %p3506_p4, 1, 0 }
  0x27   : > { %p3512_p6 = por %p318_p2, %p3495_p1  ;;  %p2602_p7 = scmp.ge.s32.totalorder %s3327_s0, 1 }
  0x28   : > { %p3517_p8 = por %p478_p5, %p94_p0  ;;  %p485_p9 = scmp.lt.s32.totalorder %s3327_s0, 5 }
  0x29   : > { %s4117_s24 = scalar_select %p3512_p6, 1, 0 }
  0x2a   : > { %s4118_s15 = scalar_select %p3517_p8, 1, 0 }
  0x2b   : > { %p3522_p10 = pnand %p2602_p7, %p485_p9  ;;  %s3329_s17 = smov [#allocation7]  }
  0x2c   : > { %4119 = sst [smem:[#allocation25_spill]] %s4118_s15  ;;  %s498_s14 = sshll.u32 %s3329_s17, 4  ;;  %s499_s14 = int_to_ptr.vmem [resolvable:$true] %s498_s14 }
  0x2d   : > { %s4120_s21 = scalar_select %p3522_p10, 1, 0 }
  0x2e   : > { %p2902_p11 = pneg %p3522_p10  ;;  %s3330_s18 = smov [#allocation9]  }
  0x2f   : > { %s509_s13 = sshll.u32 %s3330_s18, 4  ;;  %s3102_s15 = scalar_lea.vmem %s499_s14, 16  ;;  %s510_s13 = int_to_ptr.vmem [resolvable:$true] %s509_s13 }
  0x30   : > { %p3530_p12 = pnand %p2902_p11, %p3495_p1  ;;  %p3103_p0 = scmp.ne.s32.totalorder %s499_s14, %s3102_s15 }
  0x31   : > { %s3109_s17 = scalar_lea.vmem %s499_s14, 32  ;;  %p3110_p7 = scmp.lt.s32.totalorder %s499_s14, %s499_s14 }
  0x32   : > { %p3093_p13 = pneg %p3530_p12  ;;  %p3111_p9 = scmp.lt.s32.totalorder %s3109_s17, %s3102_s15 }
  0x34   : > { %p3105_p2 = pnand %p3103_p0, %p3093_p13  ;;  %p3112_p8 = por %p3111_p9, %p3110_p7 }
  0x36   : > { %p3106_p5 = pneg %p3105_p2 }
  0x38   : > { %p3113_p6 = pnand %p3112_p8, %p3106_p5 }
  0x3a   : > { %3116 = shalt.err (!%p3113_p6)
}
  0x3b   : > { %s4122_s2 = sld [smem:[#allocation33_spill]]  ;;  %s3128_s9 = scalar_lea.vmem %s510_s13, 16 }
  0x3c   : > { %p3129_p11 = scmp.ne.s32.totalorder %s510_s13, %s3128_s9  ;;  %s3135_s8 = scalar_lea.vmem %s510_s13, 32 }
  0x3d   : > { %p3136_p2 = scmp.lt.s32.totalorder %s510_s13, %s510_s13  ;;  %p3137_p4 = scmp.lt.s32.totalorder %s3135_s8, %s3128_s9 }
  0x3e   : > { %p3131_p1 = pnand %p3129_p11, %p3093_p13 }
  0x3f   : > { %p3138_p10 = por %p3137_p4, %p3136_p2 }
  0x40   : > { %p3132_p0 = pneg %p3131_p1 }
  0x41   : > { %2905 = dma.hbm_to_vmem [thread:$0]  (!%p3530_p12), %s4122_s2, 16, %s499_s14, [#allocation8]  }
  0x42   : > { %p3139_p7 = pnand %p3138_p10, %p3132_p0 }
  0x44   : > { %3142 = shalt.err (!%p3139_p7)
}
  0x45   : > { %s4123_s3 = sld [smem:[#allocation34_spill]]  ;;  %p88_p1 = scmp.ne.s32.totalorder %s3307_s26, %s3303_s25 }
  0x46   : > { %p89_p4 = scmp.eq.s32.totalorder %s3327_s0, 0  ;;  %p2922_p6 = scmp.lt.s32.totalorder %s3327_s0, 4 }
  0x47   : > { %s529_s11 = sand.u32 1, %s3307_s26   ;;  %p3563_p10 = por %p3500_p3, %p88_p1 }
  0x48   : > { %p90_p8 = por %p89_p4, %p88_p1  ;;  %s2606_s14 = sshll.u32 %s529_s11, 1 }
  0x49   : > { %s4124_s12 = scalar_select %p3563_p10, 1, 0 }
  0x4a   : > { %s2681_s18 = sshll.u32 %s3323_s30, 5  ;;  %s4126_s1 = sld [smem:[#allocation32_spill]] }
  0x4b   : > { %2908 = dma.hbm_to_vmem [thread:$0]  (!%p3530_p12), %s4123_s3, 16, %s510_s13, [#allocation8]  }
  0x4c   : > { %4125 = sst [smem:[#allocation26_spill]] %s4124_s12  ;;  %s533_s13 = scalar_lea.vmem [#allocation4], %s2606_s14 }
  0x4d   : > { %s540_s8 = sshll.u32 %s533_s13, 4  ;;  %p3573_p12 = pnand %p2922_p6, %p90_p8  ;;  %s541_s8 = int_to_ptr.vmem [resolvable:$true] %s540_s8 }
  0x4e   : > { %s530_s20 = scalar_lea.sflag [#allocation5], %s529_s11  ;;  %s3156_s3 = scalar_lea.vmem %s541_s8, 32 }
  0x4f   : > { %p3145_p3 = pneg %p3573_p12  ;;  %p3157_p13 = scmp.ne.s32.totalorder %s541_s8, %s3156_s3 }
  0x50   : > { %s539_s2 = scalar_lea.hbm %s4126_s1, %s2681_s18  ;;  %s3331_s12 = smov [#allocation4]  }
  0x51   : > { %p3159_p5 = pnand %p3157_p13, %p3145_p3  ;;  %s3161_s7 = sshll.u32 %s3331_s12, 4  ;;  %s3162_s7 = int_to_ptr.vmem [resolvable:$false] %s3161_s7 }
  0x52   : > { %s3163_s18 = scalar_lea.vmem %s3162_s7, 64  ;;  %p3164_p11 = scmp.lt.s32.totalorder %s541_s8, %s3162_s7 }
  0x53   : > { %p3160_p9 = pneg %p3159_p5  ;;  %p3165_p0 = scmp.lt.s32.totalorder %s3163_s18, %s3156_s3 }
  0x55   : > { %p3166_p2 = por %p3165_p0, %p3164_p11 }
  0x57   : > { %p3167_p7 = pnand %p3166_p2, %p3160_p9 }
  0x59   : > { %3170 = shalt.err (!%p3167_p7)
}
  0x5a   : > { %s3332_s14 = smov 16   ;;  %s3333_s11 = smov 1  }
  0x5b   : > { %2912 = dma.hbm_to_vmem [thread:$0]  (!%p3573_p12), %s539_s2, 32, %s541_s8, %s530_s20, %s3332_s14, %s3332_s14, %s3333_s11  }
  0x5c   : > { %s305_s3 = sadd.s32 1, %s3295_s23  ;;  %s45_s7 = sadd.s32 1, %s3319_s29 }
  0x5d   : > { %p312_p1 = scmp.ne.s32.totalorder %s3295_s23, %s3291_s22  ;;  %p46_p8 = scmp.ge.s32.totalorder %s45_s7, 2 }
  0x5e   : > { %s590_s12 = sand.u32 1, %s3295_s23   ;;  %s4130_s17 = sadd.s32 1, %s3323_s30 }
  0x5f   : > { %p3588_p3 = por %p312_p1, %p89_p4  ;;  %s4184_s7 = smov (%p46_p8, %s45_s7), 0 }
  0x60   : > { %4129 = sst [smem:[#allocation27_spill]] %s4184_s7  ;;  %s4186_s17 = smov (!%p46_p8, %s4130_s17), %s3323_s30 }
  0x61   : > { %s302_s2 = ssub.s32 %s3319_s29, %s4184_s7  ;;  %s2609_s8 = sshll.u32 %s590_s12, 4 }
  0x62   : > { %p50_p12 = scmp.ge.s32.totalorder %s4186_s17, 2  ;;  %p303_p13 = scmp.eq.s32.totalorder %s302_s2, 0 }
  0x63   : > { %s2682_s9 = sshll.u32 %s3319_s29, 8  ;;  %s4133_s10 = sld [smem:[#allocation40_spill]] }
  0x64   : > { %s4188_s17 = smov (%p50_p12, %s4186_s17), 0  ;;  %s594_s1 = scalar_lea.vmem [#allocation10], %s2609_s8 }
  0x65   : > { %4131 = sst [smem:[#allocation28_spill]] %s4188_s17  ;;  %s78_s20 = ssub.s32 %s3323_s30, %s4188_s17 }
  0x66   : > { %s3603_s13 = scalar_select %p303_p13, %s3295_s23, %s305_s3  }
  0x67   : > { %p79_p4 = scmp.eq.s32.totalorder %s78_s20, 0  ;;  %s601_s6 = sshll.u32 %s594_s1, 4  ;;  %s602_s6 = int_to_ptr.vmem [resolvable:$true] %s601_s6 }
  0x68   : > { %4132 = sst [smem:[#allocation29_spill]] %s3603_s13  ;;  %p3614_p5 = pnand %p2922_p6, %p3588_p3 }
  0x69   : > { %s600_s11 = scalar_lea.hbm %s4133_s10, %s2682_s9  ;;  %s4135_s2 = sadd.s32 1, %s3307_s26 }
  0x6a   : > { %s3621_s29 = scalar_select %p79_p4, %s3307_s26, %s4135_s2  }
  0x6b   : > { %s591_s3 = scalar_lea.sflag [#allocation11], %s590_s12  ;;  %p3173_p9 = pneg %p3614_p5 }
  0x6c   : > { %4136 = sst [smem:[#allocation30_spill]] %s3621_s29  ;;  %s3184_s17 = scalar_lea.vmem %s602_s6, 256 }
  0x6d   : > { %p3185_p11 = scmp.ne.s32.totalorder %s602_s6, %s3184_s17  ;;  %s3334_s8 = smov [#allocation10]  }
  0x6e   : > { %s3189_s1 = sshll.u32 %s3334_s8, 4  ;;  %s3190_s1 = int_to_ptr.vmem [resolvable:$false] %s3189_s1 }
  0x6f   : > { %p3187_p0 = pnand %p3185_p11, %p3173_p9  ;;  %s3191_s15 = scalar_lea.vmem %s3190_s1, 512 }
  0x70   : > { %p3192_p7 = scmp.lt.s32.totalorder %s602_s6, %s3190_s1  ;;  %p3193_p6 = scmp.lt.s32.totalorder %s3191_s15, %s3184_s17 }
  0x71   : > { %p3188_p2 = pneg %p3187_p0 }
  0x72   : > { %p3194_p1 = por %p3193_p6, %p3192_p7 }
  0x74   : > { %p3195_p8 = pnand %p3194_p1, %p3188_p2 }
  0x76   : > { %3198 = shalt.err (!%p3195_p8)
}
  0x77   : > { %s3335_s9 = smov 64   ;;  %s3336_s20 = smov 4  }
  0x78   : > { %2915 = dma.hbm_to_vmem [thread:$0]  (!%p3614_p5), %s600_s11, 256, %s602_s6, %s591_s3, %s3335_s9, %s3335_s9, %s3336_s20  }
  0x79   : > { %p4137_p3 = scmp.ne.s32.totalorder %s4120_s21, 0 }
  0x7a   : > { %s3630_s12 = sand.u32 (!%p4137_p3), 1, %s3303_s25   ;;  %p4138_p12 = scmp.ne.s32.totalorder (!%p4137_p3), %s4116_s16, 0 }
  0x7b   : > { %645 = sbr.rel (%p4137_p3) target bundleno = 4917 (0x1335), region = 84  ;;  %s4082_s18 = sshll.u32 (!%p4137_p3), %s3630_s12, 1 }
  0x7c   : > { %s648_s17 = scalar_lea.sflag (!%p4137_p3), [#allocation5], %s3630_s12  ;;  %s3636_s14 = scalar_lea.vmem (!%p4137_p3), [#allocation4], %s4082_s18 }
  0x80   : > { %3270 = dma.done.wait (%p4138_p12), %s648_s17, 32  }
  0x81   : > { %3272 = vsyncadd (%p4138_p12), %s648_s17, 4294967264  ;;  %p4139_p13 = scmp.ne.s32.totalorder %s4114_s19, 0 }
  0x83   : > { %3274 = dma.done.wait (%p4139_p13), [#allocation8], 32  }
  0x84   : > { %3276 = vsyncadd (%p4139_p13), [#allocation8], 4294967264  ;;  %s664_s6 = sand.u32 1, %s3291_s22   ;;  %p4140_p4 = scmp.ne.s32.totalorder %s4117_s24, 0 }
  0x85   : > { %s3647_s21 = sshll.u32 %s664_s6, 4  ;;  %s665_s7 = scalar_lea.sflag [#allocation11], %s664_s6 }
  0x86   : > { %3278 = dma.done.wait (%p4140_p4), %s665_s7, 256  }
  0x87   : > { %3280 = vsyncadd (%p4140_p4), %s665_s7, 4294967040  ;;  %s2618_s16 = sshll.u32 %s3315_s28, 1  ;;  %p773_p9 = scmp.lt.s32.totalorder %s3311_s27, 1 }
  0x88   : > { %p767_p5 = scmp.lt.s32.totalorder %s2618_s16, 3  ;;  %s4141_s8 = sld [smem:[#allocation31_spill]] }
  0x89   : > { %s3657_s19 = scalar_select %p773_p9, %s3311_s27, 1 }
  0x8a   : > { %s4190_s16 = smov (!%p767_p5, %s2618_s16), 3  ;;  %s4142_s4 = sld [smem:[#allocation35_spill]] }
  0x8b   : > { %s2619_s24 = sshll.u32 %s4190_s16, 3  ;;  %s2683_s15 = sshll.u32 %s3657_s19, 4 }
  0x8c   : > { %s4143_s30 = sld [smem:[#allocation36_spill]]  ;;  %s2685_s0 = sshll.u32 %s3657_s19, 5 }
  0x8d   : > { %s4147_s7 = sld [smem:[#allocation41_spill]]  ;;  %s4152_s22 = sshll.u32 %s3630_s12, 1 }
  0x8e   : > { %s770_s1 = scalar_lea.vmem %s4141_s8, %s2619_s24  ;;  %s4148_s18 = sld [smem:[#allocation42_spill]] }
  0x8f   : > { %s4149_s16 = sld [smem:[#allocation43_spill]]  ;;  %s3713_s6 = scalar_lea.vmem [#allocation12], %s4152_s22 }
  0x90   : > { %s3666_s17 = scalar_lea.vmem %s4142_s4, %s2683_s15  ;;  %s4150_s8 = sld [smem:[#allocation44_spill]] }
  0x91   : > { %s4151_s20 = sld [smem:[#allocation45_spill]]  ;;  %p2626_p11 = scmp.ne.s32.totalorder %s3311_s27, 0 }
  0x92   : > { %s3675_s29 = scalar_lea.vmem %s4143_s30, %s2683_s15 }
  0x93   : > { %s797_s11 = scalar_lea.vmem %s4147_s7, %s3657_s19  ;;  %817 = sbr.rel (%p2626_p11) target bundleno = 466 (0x1d2), region = 104 }
  0x94   : > { %s3697_s15 = scalar_lea.vmem %s4148_s18, %s2685_s0 }
  0x95   : > { %s805_s2 = scalar_lea.vmem %s4149_s16, %s3657_s19 }
  0x96   : > { %s808_s13 = scalar_lea.vmem %s4150_s8, %s3657_s19 }
  0x97   : > { %s811_s23 = scalar_lea.vmem %s4151_s20, %s3657_s19 }
  0x98   : > { %v818_v0 = vld [vmem:[%s770_s1] sm:$0xff]  ;;  %vm822_vm0 = vcmask 261120   ;;  %v819_v1 = vld [vmem:[%s770_s1 + $0x8] sm:$0xff] }
  0x99   : > { %v823_v2 = vsel %vm822_vm0, %v818_v0, 0.0  ;;  %v826_v3 = vsel %vm822_vm0, %v819_v1, 0.0  ;;  %v2627_v21 = vld [vmem:[#allocation7] ss:$0 sm:$0xff]  ;;  %v2628_v23 = vld [vmem:[#allocation9] ss:$0 sm:$0xff] }
  0x9a   : > { %824 = vadd.xlane.f32.xlu0 %v823_v2 }
  0x9e   : > { %827 = vadd.xlane.f32.xlu0 %v826_v3 }
 0x123   : > { %v825_v4 = vpop.xlane.xlu0 %824 }
 0x124   : > { %v830_v5 = vmul.f32 0.03125, %v825_v4 }
 0x126   : > { %v832_v6 = vsub.f32 %v818_v0, %v830_v5 }
 0x127   : > { %v828_v7 = vpop.xlane.xlu0 %827 }
 0x128   : > { %v831_v8 = vmul.f32 0.03125, %v828_v7  ;;  %v834_v9 = vmul.f32 %v832_v6, %v832_v6 }
 0x12a   : > { %v833_v10 = vsub.f32 %v819_v1, %v831_v8  ;;  %v836_v11 = vsel %vm822_vm0, %v834_v9, 0.0 }
 0x12b   : > { %837 = vadd.xlane.f32.xlu1 %v836_v11 }
 0x12c   : > { %v835_v12 = vmul.f32 %v833_v10, %v833_v10 }
 0x12e   : > { %v839_v13 = vsel %vm822_vm0, %v835_v12, 0.0 }
 0x12f   : > { %840 = vadd.xlane.f32.xlu1 %v839_v13 }
 0x1b4   : > { %v838_v14 = vpop.xlane.xlu1 %837 }
 0x1b5   : > { %v842_v15 = vmul.f32 0.03125, %v838_v14 }
 0x1b7   : > { %v844_v16 = vadd.f32 1e-12, %v842_v15 }
 0x1b8   : > { %v841_v17 = vpop.xlane.xlu1 %840 }
 0x1b9   : > { %3035 = vrsqrt.f32 %v844_v16  ;;  %v843_v18 = vmul.f32 0.03125, %v841_v17 }
 0x1bb   : > { %v845_v19 = vadd.f32 1e-12, %v843_v18 }
 0x1bd   : > { %3037 = vrsqrt.f32 %v845_v19 }
 0x1c6   : > { %v3036_v20 = vpop.eup %3035 }
 0x1c7   : > { %v848_v22 = vmul.f32 %v3036_v20, %v832_v6 }
 0x1c9   : > { %v856_v24 = vmul.f32 %v2627_v21, %v848_v22 }
 0x1ca   : > { %v3038_v25 = vpop.eup %3037 }
 0x1cb   : > { %v864_v26 = vadd.f32 %v2628_v23, %v856_v24  ;;  %v849_v27 = vmul.f32 %v3038_v25, %v833_v10 }
 0x1cd   : > { %866 = vst.msk [vmem:[#allocation2] sm:$0xff] %vm822_vm0, %v864_v26  ;;  %v857_v28 = vmul.f32 %v2627_v21, %v849_v27 }
 0x1cf   : > { %v865_v29 = vadd.f32 %v2628_v23, %v857_v28 }
 0x1d1   : > { %867 = vst.msk [vmem:[#allocation2 + $0x8] sm:$0xff] %vm822_vm0, %v865_v29 }
 0x1d2 PF: > { %v3039_v30 = vld [vmem:[%s3666_s17 + $0x8] sm:$0xff]   ;;  %v3337_v31 = vmov 0.0   ;;  %v3040_v32 = vld [vmem:[%s3666_s17] sm:$0xff]   ;;  %vm3338_vm1 = vmmov 0   ;;  %vm894_vm2 = vcmask 261120   ;;  %s4153_s17 = scalar_lea.vmem %s4057_s5, %s3657_s19  ;;  %s3339_s7 = smov 96  }
 0x1d3   : > { %2740 = vmatprep.subr.bf16.mxu1 %v3337_v31  ;;  %2754 = vmatprep.subr.bf16.mxu0 %v3337_v31  ;;  %959 = vst.msk [vmem:[#allocation3] sm:$0xff] %vm894_vm2, %v3337_v31  ;;  %960 = vst.msk [vmem:[#allocation3 + $0x8] sm:$0xff] %vm894_vm2, %v3337_v31  ;;  %v2629_v36 = vld [vmem:[%s4153_s17] ss:$0 sm:$0xff]  ;;  %vm963_vm3 = vcmask 64512   ;;  %s3340_s10 = smov 64  }
 0x1d4   : > { %2741 = vmatpush3.bf16.msra.mxu1 %v3039_v30  ;;  %2744 = vmatprep.mubr.msk.bf16.mxu1 %vm3338_vm1, %v3337_v31  ;;  %v3728_v33 = vld [vmem:[#allocation2] sm:$0xff]  ;;  %vm1087_vm4 = vcmask 1043456   ;;  %s3342_s30 = smov 88   ;;  %s3343_s18 = smov 56   ;;  %vm2231_vm5 = vcmask 523264  }
 0x1d5   : > { %2742 = vmatprep.subr.bf16.mxu1 %v3337_v31  ;;  %2756 = vmatprep.mubr.msk.bf16.mxu0 %vm3338_vm1, %v3337_v31  ;;  %v3769_v49 = vld [vmem:[%s3636_s14] ss:$0 sm:$0xff]  ;;  %v3773_v53 = vld [vmem:[%s3636_s14 + $0x1] ss:$0 sm:$0xff]  ;;  %s3341_s14 = smov 120   ;;  %s3344_s26 = smov 112  }
 0x1d6   : > { %v1182_v24 = vld [vmem:[%s3675_s29] sm:$0xf]  ;;  %s3345_s25 = smov 80   ;;  %s3346_s16 = smov 48  }
 0x1d7   : > { %v1187_v25 = vsel %vm1087_vm4, %v1182_v24, 0  ;;  %s3347_s24 = smov 72   ;;  %s3348_s3 = smov 104  }
 0x1d8   : > { %v3730_v34 = vld [vmem:[#allocation2 + $0x8] sm:$0xff]  ;;  %2743 = vmatpush3.bf16.msra.mxu1 %v3040_v32  ;;  %s3349_s8 = smov 40   ;;  %s4154_s4 = sld [smem:[#allocation37_spill]] }
 0x1d9   : > { %v870_v35 = vpack.c.bf16 %v3730_v34, %v3728_v33  ;;  %2748 = vmatprep.subr.bf16.mxu1 %v3337_v31  ;;  %s4156_s22 = scalar_lea.vmem [#allocation10], %s3647_s21  ;;  %s4158_s21 = sld [smem:[#allocation38_spill]] }
 0x1da   : > { %s4157_s0 = smov %s4156_s22  ;;  %p2675_p0 = scmp.ne.s32.totalorder %s3311_s27, 1 }
 0x1db   : > { %2745 = vmatmul.mubr.msk.bf16.vlgmr.msra.gmra.mxu1 %vm894_vm2, %v870_v35 }
 0x1dc   : > { %2750 = vmatprep.mubr.msk.bf16.mxu1 %vm3338_vm1, %v3337_v31 }
 0x1de   : > { %s4155_s20 = scalar_lea.vmem %s4154_s4, %s3657_s19 }
 0x29b   : > { %v932_v37 = vpop.f32.mrf.mxu1 }
 0x29c   : > { %v933_v38 = vadd.f32 %v2629_v36, %v932_v37 }
 0x29d   : > { %v2746_v39 = vpop.f32.mrf.mxu1 }
 0x29e   : > { %v3750_v40 = vpack.c.bf16 %v933_v38, %v933_v38 }
 0x29f   : > { %v935_v41 = vpop.f32.mrf.mxu1 }
 0x2a0   : > { %v936_v42 = vadd.f32 %v2629_v36, %v935_v41  ;;  %961 = vrot.lane.b32.xlu0 %v3750_v40, %s3339_s7 }
 0x2a1   : > { %v2747_v43 = vpop.f32.mrf.mxu1 }
 0x2a2   : > { %v3753_v44 = vpack.c.bf16 %v936_v42, %v936_v42 }
 0x2a4   : > { %1010 = vrot.lane.b32.xlu0 %v3753_v44, %s3339_s7  ;;  %s4159_s7 = scalar_lea.vmem %s4158_s21, %s3657_s19 }
 0x312   : > { %v962_v45 = vpop.permute.xlu0 %961 }
 0x313   : > { %v968_v46 = vsel %vm963_vm3, %v962_v45, 0 }
 0x314   : > { %2749 = vmatpush3.bf16.xpose.msra.mxu1 %v968_v46 }
 0x315   : > { %2760 = vmatprep.subr.bf16.mxu1 %v3337_v31 }
 0x316   : > { %v1011_v47 = vpop.permute.xlu0 %1010 }
 0x317   : > { %v1016_v48 = vsel %vm963_vm3, %v1011_v47, 0 }
 0x318   : > { %2755 = vmatpush3.bf16.xpose.msra.mxu0 %v1016_v48 }
 0x319   : > { %2766 = vmatprep.subr.bf16.mxu0 %v3337_v31 }
 0x31b   : > { %2751 = vmatmul.mubr.msk.bf16.vlgmr.msra.gmra.mxu1 %vm963_vm3, %v3750_v40 }
 0x31c   : > { %2762 = vmatprep.mubr.msk.bf16.mxu1 %vm3338_vm1, %v3337_v31 }
 0x31f   : > { %2757 = vmatmul.mubr.msk.bf16.vlgmr.msra.gmra.mxu0 %vm963_vm3, %v3753_v44 }
 0x320   : > { %2768 = vmatprep.mubr.msk.bf16.mxu0 %vm3338_vm1, %v3337_v31 }
 0x3db   : > { %v1004_v50 = vpop.f32.mrf.mxu1 }
 0x3dc   : > { %v1005_v51 = vadd.f32 %v3769_v49, %v1004_v50 }
 0x3dd   : > { %v2752_v52 = vpop.f32.mrf.mxu1 }
 0x3de   : > { %v1058_v54 = vsel %vm963_vm3, %v1005_v51, -inf }
 0x3df   : > { %v1052_v55 = vpop.f32.mrf.mxu0  ;;  %1059 = vmax.xlane.f32.xlu1 %v1058_v54  ;;  %v1007_v56 = vpop.f32.mrf.mxu1 }
 0x3e0   : > { %v1053_v57 = vadd.f32 %v3773_v53, %v1052_v55  ;;  %v1179_v56 = vld [vmem:[#allocation3] sm:$0xff] }
 0x3e1   : > { %v2753_v58 = vpop.f32.mrf.mxu1  ;;  %v2758_v59 = vpop.f32.mrf.mxu0 }
 0x3e2   : > { %v1061_v60 = vsel %vm963_vm3, %v1053_v57, -inf }
 0x3e3   : > { %v1055_v61 = vpop.f32.mrf.mxu0  ;;  %1062 = vmax.xlane.f32.xlu1 %v1061_v60  ;;  %v1180_v60 = vld [vmem:[#allocation3 + $0x8] sm:$0xff] }
 0x3e5   : > { %v2759_v62 = vpop.f32.mrf.mxu0 }
 0x3f4   : > { %1082 = vrot.lane.b32.xlu1 %v3750_v40, %s3340_s10 }
 0x468   : > { %v1060_v63 = vpop.xlane.xlu1 %1059 }
 0x469   : > { %v1064_v0 = vsub.f32 %v1005_v51, %v1060_v63 }
 0x46b   : > { %v1066_v1 = vmul.f32 1.442695, %v1064_v0 }
 0x46c   : > { %v1063_v2 = vpop.xlane.xlu1 %1062 }
 0x46d   : > { %3047 = vpow2.f32 %v1066_v1  ;;  %v1065_v3 = vsub.f32 %v1053_v57, %v1063_v2 }
 0x46f   : > { %v1068_v4 = vmul.f32 1.442695, %v1065_v3 }
 0x470   : > { %v1083_v5 = vpop.permute.xlu1 %1082 }
 0x471   : > { %3049 = vpow2.f32 %v1068_v4  ;;  %v1089_v6 = vsel %vm1087_vm4, %v1083_v5, 0 }
 0x472   : > { %2761 = vmatpush3.bf16.msra.mxu1 %v1089_v6 }
 0x473   : > { %2772 = vmatprep.subr.bf16.mxu1 %v3337_v31 }
 0x47a   : > { %v3048_v7 = vpop.eup %3047 }
 0x47b   : > { %v1070_v8 = vsel %vm963_vm3, %v3048_v7, 0.0 }
 0x47c   : > { %1071 = vadd.xlane.f32.xlu0 %v1070_v8 }
 0x47e   : > { %v3050_v9 = vpop.eup %3049 }
 0x47f   : > { %v1073_v10 = vsel %vm963_vm3, %v3050_v9, 0.0 }
 0x480   : > { %1074 = vadd.xlane.f32.xlu1 %v1073_v10 }
 0x491   : > { %1131 = vrot.lane.b32.xlu1 %v3753_v44, %s3340_s10 }
 0x492   : > { %1234 = vrot.lane.b32.xlu0 %v3750_v40, %s3341_s14 }
 0x495   : > { %1236 = vrot.lane.b32.xlu1 %v3750_v40, %s3342_s30 }
 0x499   : > { %1286 = vrot.lane.b32.xlu1 %v3753_v44, %s3342_s30  ;;  %s4160_s30 = sld [smem:[#allocation39_spill]] }
 0x49d   : > { %1284 = vrot.lane.b32.xlu1 %v3753_v44, %s3341_s14 }
 0x505   : > { %v1072_v11 = vpop.xlane.xlu0 %1071 }
 0x506   : > { %3051 = vrcp.f32 %v1072_v11 }
 0x509   : > { %v1075_v12 = vpop.xlane.xlu1 %1074  ;;  %v1235_v23 = vpop.permute.xlu0 %1234 }
 0x50a   : > { %3053 = vrcp.f32 %v1075_v12 }
 0x50d   : > { %v1132_v13 = vpop.permute.xlu1 %1131 }
 0x50e   : > { %v1137_v14 = vsel %vm1087_vm4, %v1132_v13, 0 }
 0x50f   : > { %2767 = vmatpush3.bf16.msra.mxu0 %v1137_v14 }
 0x510   : > { %2778 = vmatprep.subr.bf16.mxu0 %v3337_v31 }
 0x511   : > { %v1237_v20 = vpop.permute.xlu1 %1236 }
 0x512   : > { %v1242_v22 = vsel %vm963_vm3, %v1237_v20, 0 }
 0x513   : > { %v3052_v15 = vpop.eup %3051 }
 0x514   : > { %v1078_v16 = vmul.f32 %v3052_v15, %v3048_v7 }
 0x515   : > { %v1287_v28 = vpop.permute.xlu1 %1286 }
 0x516   : > { %v1080_v17 = vpack.c.bf16 %v1078_v16, %v1078_v16  ;;  %v1292_v37 = vsel %vm963_vm3, %v1287_v28, 0 }
 0x517   : > { %v3054_v18 = vpop.eup %3053 }
 0x518   : > { %2763 = vmatmul.mubr.msk.bf16.vlgmr.msra.gmra.mxu1 %vm963_vm3, %v1080_v17  ;;  %v1079_v19 = vmul.f32 %v3054_v18, %v3050_v9 }
 0x519   : > { %2774 = vmatprep.mubr.msk.bf16.mxu1 %vm3338_vm1, %v3337_v31  ;;  %2773 = vmatpush3.bf16.msra.mxu1 %v1187_v25  ;;  %v1285_v43 = vpop.permute.xlu1 %1284 }
 0x51a   : > { %v1081_v21 = vpack.c.bf16 %v1079_v19, %v1079_v19  ;;  %2784 = vmatprep.subr.bf16.mxu1 %v3337_v31 }
 0x51c   : > { %2769 = vmatmul.mubr.msk.bf16.vlgmr.msra.gmra.mxu0 %vm963_vm3, %v1081_v21 }
 0x51d   : > { %2779 = vmatpush3.bf16.xpose.msra.mxu0 %v1242_v22  ;;  %2780 = vmatprep.mubr.msk.bf16.mxu0 %vm3338_vm1, %v3337_v31 }
 0x51e   : > { %2790 = vmatprep.subr.bf16.mxu0 %v3337_v31 }
 0x524   : > { %2781 = vmatmul.mubr.msk.bf16.vlgmr.msra.gmra.mxu0 %vm963_vm3, %v1235_v23 }
 0x525   : > { %2792 = vmatprep.mubr.msk.bf16.mxu0 %vm3338_vm1, %v3337_v31 }
 0x5d8   : > { %v1125_v26 = vpop.f32.mrf.mxu1 }
 0x5da   : > { %v2764_v27 = vpop.f32.mrf.mxu1 }
 0x5dc   : > { %v1128_v29 = vpop.f32.mrf.mxu1  ;;  %v1173_v30 = vpop.f32.mrf.mxu0 }
 0x5dd   : > { %v1181_v32 = vpack.c.bf16 %v1173_v30, %v1125_v26  ;;  %v2646_v26 = vld [vmem:[%s3675_s29 + $0x4] sm:$0xf] }
 0x5de   : > { %v2765_v35 = vpop.f32.mrf.mxu1  ;;  %v2770_v36 = vpop.f32.mrf.mxu0  ;;  %v1463_v27 = vsel %vm1087_vm4, %v2646_v26, 0 }
 0x5df   : > { %2775 = vmatmul.mubr.msk.bf16.vlgmr.msra.gmra.mxu1 %vm963_vm3, %v1181_v32 }
 0x5e0   : > { %2785 = vmatpush3.bf16.xpose.msra.mxu1 %v1292_v37  ;;  %v1176_v38 = vpop.f32.mrf.mxu0  ;;  %2786 = vmatprep.mubr.msk.bf16.mxu1 %vm3338_vm1, %v3337_v31 }
 0x5e1   : > { %2796 = vmatprep.subr.bf16.mxu1 %v3337_v31 }
 0x5e2   : > { %v2771_v39 = vpop.f32.mrf.mxu0 }
 0x5e4   : > { %v1278_v41 = vpop.f32.mrf.mxu0 }
 0x5e5   : > { %v1279_v42 = vadd.f32 %v3769_v49, %v1278_v41 }
 0x5e6   : > { %v2782_v45 = vpop.f32.mrf.mxu0 }
 0x5e7   : > { %2787 = vmatmul.mubr.msk.bf16.vlgmr.msra.gmra.mxu1 %vm963_vm3, %v1285_v43  ;;  %v1334_v46 = vsel %vm963_vm3, %v1279_v42, -inf }
 0x5e8   : > { %1335 = vmax.xlane.f32.xlu1 %v1334_v46  ;;  %v1281_v47 = vpop.f32.mrf.mxu0  ;;  %2798 = vmatprep.mubr.msk.bf16.mxu1 %vm3338_vm1, %v3337_v31 }
 0x5ea   : > { %v2783_v48 = vpop.f32.mrf.mxu0 }
 0x671   : > { %v1336_v50 = vpop.xlane.xlu1 %1335 }
 0x672   : > { %v1340_v51 = vsub.f32 %v1279_v42, %v1336_v50 }
 0x674   : > { %v1342_v52 = vmul.f32 1.442695, %v1340_v51 }
 0x676   : > { %3055 = vpow2.f32 %v1342_v52 }
 0x683   : > { %v3056_v54 = vpop.eup %3055 }
 0x684   : > { %v1346_v55 = vsel %vm963_vm3, %v3056_v54, 0.0 }
 0x685   : > { %1347 = vadd.xlane.f32.xlu1 %v1346_v55 }
 0x69f   : > { %v1223_v57 = vpop.f32.mrf.mxu1 }
 0x6a0   : > { %v1230_v58 = vadd.f32 %v1223_v57, %v1179_v56 }
 0x6a1   : > { %v2776_v59 = vpop.f32.mrf.mxu1 }
 0x6a2   : > { %1232 = vst.msk [vmem:[#allocation3] sm:$0xff] %vm894_vm2, %v1230_v58 }
 0x6a3   : > { %v1226_v61 = vpop.f32.mrf.mxu1 }
 0x6a4   : > { %v1231_v62 = vadd.f32 %v1226_v61, %v1180_v60 }
 0x6a5   : > { %v2777_v63 = vpop.f32.mrf.mxu1 }
 0x6a6   : > { %1233 = vst.msk [vmem:[#allocation3 + $0x8] sm:$0xff] %vm894_vm2, %v1231_v62 }
 0x6a7   : > { %v1328_v0 = vpop.f32.mrf.mxu1 }
 0x6a8   : > { %v1329_v1 = vadd.f32 %v3773_v53, %v1328_v0 }
 0x6a9   : > { %v2788_v2 = vpop.f32.mrf.mxu1  ;;  %v1454_v58 = vld [vmem:[#allocation3] sm:$0xff] }
 0x6aa   : > { %v1337_v3 = vsel %vm963_vm3, %v1329_v1, -inf }
 0x6ab   : > { %1338 = vmax.xlane.f32.xlu0 %v1337_v3  ;;  %v1331_v4 = vpop.f32.mrf.mxu1 }
 0x6ad   : > { %v2789_v5 = vpop.f32.mrf.mxu1  ;;  %v1455_v62 = vld [vmem:[#allocation3 + $0x8] sm:$0xff] }
 0x6c1   : > { %1406 = vrot.lane.b32.xlu0 %v3753_v44, %s3343_s18 }
 0x6c5   : > { %1510 = vrot.lane.b32.xlu0 %v3750_v40, %s3344_s26 }
 0x70e   : > { %v1348_v13 = vpop.xlane.xlu1 %1347 }
 0x734   : > { %v1339_v6 = vpop.xlane.xlu0 %1338 }
 0x735   : > { %v1341_v7 = vsub.f32 %v1329_v1, %v1339_v6 }
 0x737   : > { %v1344_v8 = vmul.f32 1.442695, %v1341_v7 }
 0x738   : > { %v1407_v9 = vpop.permute.xlu0 %1406 }
 0x739   : > { %3057 = vpow2.f32 %v1344_v8  ;;  %v1412_v10 = vsel %vm1087_vm4, %v1407_v9, 0 }
 0x73a   : > { %2797 = vmatpush3.bf16.msra.mxu1 %v1412_v10  ;;  %3059 = vrcp.f32 %v1348_v13 }
 0x73b   : > { %2808 = vmatprep.subr.bf16.mxu1 %v3337_v31 }
 0x73c   : > { %v1511_v25 = vpop.permute.xlu0 %1510 }
 0x746   : > { %v3058_v11 = vpop.eup %3057 }
 0x747   : > { %v1349_v12 = vsel %vm963_vm3, %v3058_v11, 0.0  ;;  %v3060_v14 = vpop.eup %3059 }
 0x748   : > { %1350 = vadd.xlane.f32.xlu1 %v1349_v12  ;;  %v1354_v16 = vmul.f32 %v3060_v14, %v3056_v54 }
 0x74a   : > { %v1356_v19 = vpack.c.bf16 %v1354_v16, %v1354_v16 }
 0x759   : > { %1358 = vrot.lane.b32.xlu1 %v3750_v40, %s3343_s18  ;;  %s4161_s18 = scalar_lea.vmem %s4160_s30, %s3657_s19 }
 0x75d   : > { %1512 = vrot.lane.b32.xlu1 %v3750_v40, %s3345_s25 }
 0x761   : > { %1562 = vrot.lane.b32.xlu1 %v3753_v44, %s3345_s25 }
 0x765   : > { %1560 = vrot.lane.b32.xlu1 %v3753_v44, %s3344_s26 }
 0x7d1   : > { %v1351_v15 = vpop.xlane.xlu1 %1350 }
 0x7d2   : > { %3061 = vrcp.f32 %v1351_v15 }
 0x7d5   : > { %v1359_v17 = vpop.permute.xlu1 %1358 }
 0x7d6   : > { %v1364_v18 = vsel %vm1087_vm4, %v1359_v17, 0 }
 0x7d7   : > { %2791 = vmatpush3.bf16.msra.mxu0 %v1364_v18 }
 0x7d8   : > { %2802 = vmatprep.subr.bf16.mxu0 %v3337_v31 }
 0x7d9   : > { %v1513_v22 = vpop.permute.xlu1 %1512 }
 0x7da   : > { %2793 = vmatmul.mubr.msk.bf16.vlgmr.msra.gmra.mxu0 %vm963_vm3, %v1356_v19  ;;  %v1518_v24 = vsel %vm963_vm3, %v1513_v22, 0  ;;  %v2652_v19 = vld [vmem:[%s3675_s29 + $0x8] sm:$0xf] }
 0x7db   : > { %2804 = vmatprep.mubr.msk.bf16.mxu0 %vm3338_vm1, %v3337_v31  ;;  %2803 = vmatpush3.bf16.msra.mxu0 %v1463_v27 }
 0x7dc   : > { %2814 = vmatprep.subr.bf16.mxu0 %v3337_v31 }
 0x7dd   : > { %v1563_v35 = vpop.permute.xlu1 %1562 }
 0x7de   : > { %v1568_v39 = vsel %vm963_vm3, %v1563_v35, 0 }
 0x7df   : > { %v3062_v20 = vpop.eup %3061 }
 0x7e0   : > { %v1355_v21 = vmul.f32 %v3062_v20, %v3058_v11  ;;  %v1739_v20 = vsel %vm1087_vm4, %v2652_v19, 0 }
 0x7e1   : > { %v1561_v46 = vpop.permute.xlu1 %1560 }
 0x7e2   : > { %v1357_v23 = vpack.c.bf16 %v1355_v21, %v1355_v21 }
 0x7e4   : > { %2799 = vmatmul.mubr.msk.bf16.vlgmr.msra.gmra.mxu1 %vm963_vm3, %v1357_v23 }
 0x7e5   : > { %2809 = vmatpush3.bf16.xpose.msra.mxu1 %v1518_v24  ;;  %2810 = vmatprep.mubr.msk.bf16.mxu1 %vm3338_vm1, %v3337_v31 }
 0x7e6   : > { %2820 = vmatprep.subr.bf16.mxu1 %v3337_v31 }
 0x7ec   : > { %2811 = vmatmul.mubr.msk.bf16.vlgmr.msra.gmra.mxu1 %vm963_vm3, %v1511_v25 }
 0x7ed   : > { %2822 = vmatprep.mubr.msk.bf16.mxu1 %vm3338_vm1, %v3337_v31 }
 0x89a   : > { %v1400_v28 = vpop.f32.mrf.mxu0 }
 0x89c   : > { %v2794_v29 = vpop.f32.mrf.mxu0 }
 0x89e   : > { %v1403_v30 = vpop.f32.mrf.mxu0 }
 0x8a0   : > { %v2795_v32 = vpop.f32.mrf.mxu0 }
 0x8a4   : > { %v1448_v36 = vpop.f32.mrf.mxu1 }
 0x8a5   : > { %v1456_v37 = vpack.c.bf16 %v1448_v36, %v1400_v28 }
 0x8a6   : > { %v2800_v38 = vpop.f32.mrf.mxu1 }
 0x8a7   : > { %2805 = vmatmul.mubr.msk.bf16.vlgmr.msra.gmra.mxu0 %vm963_vm3, %v1456_v37 }
 0x8a8   : > { %2815 = vmatpush3.bf16.xpose.msra.mxu0 %v1568_v39  ;;  %v1451_v41 = vpop.f32.mrf.mxu1  ;;  %2816 = vmatprep.mubr.msk.bf16.mxu0 %vm3338_vm1, %v3337_v31 }
 0x8a9   : > { %2826 = vmatprep.subr.bf16.mxu0 %v3337_v31 }
 0x8aa   : > { %v2801_v42 = vpop.f32.mrf.mxu1 }
 0x8ac   : > { %v1554_v43 = vpop.f32.mrf.mxu1 }
 0x8ad   : > { %v1555_v45 = vadd.f32 %v3769_v49, %v1554_v43 }
 0x8ae   : > { %v2812_v47 = vpop.f32.mrf.mxu1 }
 0x8af   : > { %2817 = vmatmul.mubr.msk.bf16.vlgmr.msra.gmra.mxu0 %vm963_vm3, %v1561_v46  ;;  %v1610_v48 = vsel %vm963_vm3, %v1555_v45, -inf }
 0x8b0   : > { %1611 = vmax.xlane.f32.xlu0 %v1610_v48  ;;  %v1557_v50 = vpop.f32.mrf.mxu1  ;;  %2828 = vmatprep.mubr.msk.bf16.mxu0 %vm3338_vm1, %v3337_v31 }
 0x8b2   : > { %v2813_v51 = vpop.f32.mrf.mxu1 }
 0x939   : > { %v1612_v52 = vpop.xlane.xlu0 %1611 }
 0x93a   : > { %v1616_v54 = vsub.f32 %v1555_v45, %v1612_v52 }
 0x93c   : > { %v1618_v55 = vmul.f32 1.442695, %v1616_v54 }
 0x93e   : > { %3063 = vpow2.f32 %v1618_v55 }
 0x94b   : > { %v3064_v56 = vpop.eup %3063 }
 0x94c   : > { %v1622_v57 = vsel %vm963_vm3, %v3064_v56, 0.0 }
 0x94d   : > { %1623 = vadd.xlane.f32.xlu0 %v1622_v57 }
 0x967   : > { %v1499_v59 = vpop.f32.mrf.mxu0 }
 0x968   : > { %v1506_v60 = vadd.f32 %v1499_v59, %v1454_v58 }
 0x969   : > { %v2806_v61 = vpop.f32.mrf.mxu0 }
 0x96a   : > { %1508 = vst.msk [vmem:[#allocation3] sm:$0xff] %vm894_vm2, %v1506_v60 }
 0x96b   : > { %v1502_v63 = vpop.f32.mrf.mxu0 }
 0x96c   : > { %v1507_v0 = vadd.f32 %v1502_v63, %v1455_v62 }
 0x96d   : > { %v2807_v1 = vpop.f32.mrf.mxu0 }
 0x96e   : > { %1509 = vst.msk [vmem:[#allocation3 + $0x8] sm:$0xff] %vm894_vm2, %v1507_v0 }
 0x96f   : > { %v1604_v2 = vpop.f32.mrf.mxu0 }
 0x970   : > { %v1605_v3 = vadd.f32 %v3773_v53, %v1604_v2 }
 0x971   : > { %v2818_v4 = vpop.f32.mrf.mxu0 }
 0x972   : > { %v1613_v5 = vsel %vm963_vm3, %v1605_v3, -inf }
 0x973   : > { %1614 = vmax.xlane.f32.xlu1 %v1613_v5  ;;  %v1607_v6 = vpop.f32.mrf.mxu0 }
 0x975   : > { %v2819_v7 = vpop.f32.mrf.mxu0  ;;  %v1731_v63 = vld [vmem:[#allocation3 + $0x8] sm:$0xff] }
 0x984   : > { %1634 = vrot.lane.b32.xlu1 %v3750_v40, %s3346_s16 }
 0x988   : > { %1788 = vrot.lane.b32.xlu1 %v3750_v40, %s3347_s24 }
 0x98c   : > { %1838 = vrot.lane.b32.xlu1 %v3753_v44, %s3347_s24 }
 0x990   : > { %1836 = vrot.lane.b32.xlu1 %v3753_v44, %s3348_s3 }
 0x9d6   : > { %v1624_v8 = vpop.xlane.xlu0 %1623 }
 0x9d7   : > { %3065 = vrcp.f32 %v1624_v8 }
 0x9e4   : > { %v3066_v9 = vpop.eup %3065 }
 0x9e5   : > { %v1630_v13 = vmul.f32 %v3066_v9, %v3064_v56 }
 0x9e7   : > { %v1632_v16 = vpack.c.bf16 %v1630_v13, %v1630_v13 }
 0x9fc   : > { %v1615_v10 = vpop.xlane.xlu1 %1614 }
 0x9fd   : > { %v1617_v11 = vsub.f32 %v1605_v3, %v1615_v10 }
 0x9ff   : > { %v1620_v12 = vmul.f32 1.442695, %v1617_v11 }
 0xa00   : > { %v1635_v14 = vpop.permute.xlu1 %1634 }
 0xa01   : > { %3067 = vpow2.f32 %v1620_v12  ;;  %v1640_v15 = vsel %vm1087_vm4, %v1635_v14, 0 }
 0xa02   : > { %2821 = vmatpush3.bf16.msra.mxu1 %v1640_v15 }
 0xa03   : > { %2832 = vmatprep.subr.bf16.mxu1 %v3337_v31 }
 0xa04   : > { %v1789_v26 = vpop.permute.xlu1 %1788 }
 0xa05   : > { %2823 = vmatmul.mubr.msk.bf16.vlgmr.msra.gmra.mxu1 %vm963_vm3, %v1632_v16  ;;  %v1794_v28 = vsel %vm963_vm3, %v1789_v26, 0 }
 0xa06   : > { %2834 = vmatprep.mubr.msk.bf16.mxu1 %vm3338_vm1, %v3337_v31  ;;  %2833 = vmatpush3.bf16.msra.mxu1 %v1739_v20 }
 0xa07   : > { %2844 = vmatprep.subr.bf16.mxu1 %v3337_v31 }
 0xa08   : > { %v1839_v37 = vpop.permute.xlu1 %1838 }
 0xa09   : > { %v1844_v42 = vsel %vm963_vm3, %v1839_v37, 0 }
 0xa0c   : > { %v1837_v48 = vpop.permute.xlu1 %1836 }
 0xa0e   : > { %v3068_v17 = vpop.eup %3067 }
 0xa0f   : > { %v1625_v18 = vsel %vm963_vm3, %v3068_v17, 0.0 }
 0xa10   : > { %1626 = vadd.xlane.f32.xlu0 %v1625_v18  ;;  %v2658_v18 = vld [vmem:[%s3675_s29 + $0xc] sm:$0xf] }
 0xa11   : > { %v2015_v19 = vsel %vm1087_vm4, %v2658_v18, 0  ;;  %v3043_v18 = vld [vmem:[%s3697_s15 + $0x18] sm:$0xff]  }
 0xa26   : > { %1682 = vrot.lane.b32.xlu0 %v3753_v44, %s3346_s16 }
 0xa2a   : > { %1786 = vrot.lane.b32.xlu0 %v3750_v40, %s3348_s3 }
 0xa99   : > { %v1627_v21 = vpop.xlane.xlu0 %1626 }
 0xa9a   : > { %3069 = vrcp.f32 %v1627_v21 }
 0xa9d   : > { %v1683_v22 = vpop.permute.xlu0 %1682 }
 0xa9e   : > { %v1688_v23 = vsel %vm1087_vm4, %v1683_v22, 0 }
 0xa9f   : > { %2827 = vmatpush3.bf16.msra.mxu0 %v1688_v23 }
 0xaa0   : > { %2838 = vmatprep.subr.bf16.mxu0 %v3337_v31 }
 0xaa1   : > { %v1787_v29 = vpop.permute.xlu0 %1786 }
 0xaa7   : > { %v3070_v24 = vpop.eup %3069 }
 0xaa8   : > { %v1631_v25 = vmul.f32 %v3070_v24, %v3068_v17 }
 0xaaa   : > { %v1633_v27 = vpack.c.bf16 %v1631_v25, %v1631_v25 }
 0xaac   : > { %2829 = vmatmul.mubr.msk.bf16.vlgmr.msra.gmra.mxu0 %vm963_vm3, %v1633_v27 }
 0xaad   : > { %2839 = vmatpush3.bf16.xpose.msra.mxu0 %v1794_v28  ;;  %2840 = vmatprep.mubr.msk.bf16.mxu0 %vm3338_vm1, %v3337_v31 }
 0xaae   : > { %2850 = vmatprep.subr.bf16.mxu0 %v3337_v31 }
 0xab4   : > { %2841 = vmatmul.mubr.msk.bf16.vlgmr.msra.gmra.mxu0 %vm963_vm3, %v1787_v29 }
 0xab5   : > { %2852 = vmatprep.mubr.msk.bf16.mxu0 %vm3338_vm1, %v3337_v31 }
 0xac5   : > { %v1676_v30 = vpop.f32.mrf.mxu1 }
 0xac7   : > { %v2824_v32 = vpop.f32.mrf.mxu1 }
 0xac9   : > { %v1679_v35 = vpop.f32.mrf.mxu1 }
 0xacb   : > { %v2825_v36 = vpop.f32.mrf.mxu1 }
 0xb6c   : > { %v1724_v38 = vpop.f32.mrf.mxu0 }
 0xb6d   : > { %v1732_v39 = vpack.c.bf16 %v1724_v38, %v1676_v30 }
 0xb6e   : > { %v2830_v41 = vpop.f32.mrf.mxu0 }
 0xb6f   : > { %2835 = vmatmul.mubr.msk.bf16.vlgmr.msra.gmra.mxu1 %vm963_vm3, %v1732_v39 }
 0xb70   : > { %2845 = vmatpush3.bf16.xpose.msra.mxu1 %v1844_v42  ;;  %v1727_v43 = vpop.f32.mrf.mxu0  ;;  %2846 = vmatprep.mubr.msk.bf16.mxu1 %vm3338_vm1, %v3337_v31 }
 0xb71   : > { %2856 = vmatprep.subr.bf16.mxu1 %v3337_v31 }
 0xb72   : > { %v2831_v45 = vpop.f32.mrf.mxu0 }
 0xb74   : > { %v1830_v46 = vpop.f32.mrf.mxu0 }
 0xb75   : > { %v1831_v47 = vadd.f32 %v3769_v49, %v1830_v46  ;;  %v1730_v49 = vld [vmem:[#allocation3] sm:$0xff] }
 0xb76   : > { %v2842_v50 = vpop.f32.mrf.mxu0 }
 0xb77   : > { %2847 = vmatmul.mubr.msk.bf16.vlgmr.msra.gmra.mxu1 %vm963_vm3, %v1837_v48  ;;  %v1886_v51 = vsel %vm963_vm3, %v1831_v47, -inf  ;;  %v2660_v48 = vld [vmem:[%s4155_s20] ss:$0 sm:$0xff] }
 0xb78   : > { %1887 = vmax.xlane.f32.xlu0 %v1886_v51  ;;  %v1833_v52 = vpop.f32.mrf.mxu0  ;;  %2858 = vmatprep.mubr.msk.bf16.mxu1 %vm3338_vm1, %v3337_v31 }
 0xb7a   : > { %v2843_v54 = vpop.f32.mrf.mxu0 }
 0xc01   : > { %v1888_v55 = vpop.xlane.xlu0 %1887 }
 0xc02   : > { %v1892_v56 = vsub.f32 %v1831_v47, %v1888_v55 }
 0xc04   : > { %v1894_v57 = vmul.f32 1.442695, %v1892_v56 }
 0xc06   : > { %3071 = vpow2.f32 %v1894_v57 }
 0xc13   : > { %v3072_v58 = vpop.eup %3071 }
 0xc14   : > { %v1898_v59 = vsel %vm963_vm3, %v3072_v58, 0.0 }
 0xc15   : > { %1899 = vadd.xlane.f32.xlu0 %v1898_v59 }
 0xc2f   : > { %v1775_v60 = vpop.f32.mrf.mxu1 }
 0xc30   : > { %v1782_v61 = vadd.f32 %v1775_v60, %v1730_v49 }
 0xc31   : > { %v2836_v62 = vpop.f32.mrf.mxu1 }
 0xc32   : > { %1784 = vst.msk [vmem:[#allocation3] sm:$0xff] %vm894_vm2, %v1782_v61 }
 0xc33   : > { %v1778_v0 = vpop.f32.mrf.mxu1 }
 0xc34   : > { %v1783_v1 = vadd.f32 %v1778_v0, %v1731_v63 }
 0xc35   : > { %v2837_v2 = vpop.f32.mrf.mxu1 }
 0xc36   : > { %1785 = vst.msk [vmem:[#allocation3 + $0x8] sm:$0xff] %vm894_vm2, %v1783_v1  ;;  %v3041_v1 = vld [vmem:[%s4156_s22 + $0x8] sm:$0xff]  }
 0xc37   : > { %v1880_v3 = vpop.f32.mrf.mxu1  ;;  %v3042_v2 = vld [vmem:[%s4157_s0] sm:$0xff]  }
 0xc38   : > { %v1881_v4 = vadd.f32 %v3773_v53, %v1880_v3 }
 0xc39   : > { %v2848_v5 = vpop.f32.mrf.mxu1  ;;  %v2006_v37 = vld [vmem:[#allocation3] sm:$0xff] }
 0xc3a   : > { %v1889_v6 = vsel %vm963_vm3, %v1881_v4, -inf }
 0xc3b   : > { %1890 = vmax.xlane.f32.xlu1 %v1889_v6  ;;  %v1883_v7 = vpop.f32.mrf.mxu1 }
 0xc3d   : > { %v2849_v8 = vpop.f32.mrf.mxu1  ;;  %v2007_v42 = vld [vmem:[#allocation3 + $0x8] sm:$0xff] }
 0xc4c   : > { %1910 = vrot.lane.b32.xlu1 %v3750_v40, %s3349_s8 }
 0xc9e   : > { %v1900_v9 = vpop.xlane.xlu0 %1899 }
 0xc9f   : > { %3073 = vrcp.f32 %v1900_v9 }
 0xcac   : > { %v3074_v10 = vpop.eup %3073 }
 0xcad   : > { %v1906_v14 = vmul.f32 %v3074_v10, %v3072_v58 }
 0xcaf   : > { %v1908_v16 = vpack.c.bf16 %v1906_v14, %v1906_v14 }
 0xcc4   : > { %v1891_v11 = vpop.xlane.xlu1 %1890 }
 0xcc5   : > { %v1893_v12 = vsub.f32 %v1881_v4, %v1891_v11  ;;  %v2661_v11 = vld [vmem:[%s4159_s7] ss:$0 sm:$0xff] }
 0xcc7   : > { %v1896_v13 = vmul.f32 1.442695, %v1893_v12 }
 0xcc8   : > { %v1911_v15 = vpop.permute.xlu1 %1910 }
 0xcc9   : > { %3075 = vpow2.f32 %v1896_v13  ;;  %v1916_v53 = vsel %vm1087_vm4, %v1911_v15, 0  ;;  %v2662_v15 = vld [vmem:[%s4161_s18] ss:$0 sm:$0xff] }
 0xcca   : > { %2851 = vmatpush3.bf16.msra.mxu0 %v1916_v53 }
 0xccb   : > { %2862 = vmatprep.subr.bf16.mxu0 %v3337_v31 }
 0xccd   : > { %2853 = vmatmul.mubr.msk.bf16.vlgmr.msra.gmra.mxu0 %vm963_vm3, %v1908_v16 }
 0xcce   : > { %2864 = vmatprep.mubr.msk.bf16.mxu0 %vm3338_vm1, %v3337_v31  ;;  %2863 = vmatpush3.bf16.msra.mxu0 %v2015_v19  ;;  %v3044_v19 = vld [vmem:[%s3697_s15 + $0x10] sm:$0xff]  }
 0xccf   : > { %2876 = vmatprep.subr.bf16.mxu0 %v3337_v31 }
 0xcd6   : > { %v3076_v40 = vpop.eup %3075 }
 0xcd7   : > { %v1901_v17 = vsel %vm963_vm3, %v3076_v40, 0.0 }
 0xcd8   : > { %1902 = vadd.xlane.f32.xlu0 %v1901_v17 }
 0xcee   : > { %1958 = vrot.lane.b32.xlu0 %v3753_v44, %s3349_s8 }
 0xd61   : > { %v1903_v20 = vpop.xlane.xlu0 %1902 }
 0xd62   : > { %3077 = vrcp.f32 %v1903_v20  ;;  %v3045_v20 = vld [vmem:[%s3697_s15 + $0x8] sm:$0xff]  }
 0xd65   : > { %v1959_v21 = vpop.permute.xlu0 %1958 }
 0xd66   : > { %v1964_v22 = vsel %vm1087_vm4, %v1959_v21, 0  ;;  %v3046_v21 = vld [vmem:[%s3697_s15] sm:$0xff]  }
 0xd67   : > { %2857 = vmatpush3.bf16.msra.mxu1 %v1964_v22  ;;  %v2663_v22 = vld [vmem:[%s797_s11] ss:$0 sm:$0xff] }
 0xd68   : > { %2868 = vmatprep.subr.bf16.mxu1 %v3337_v31 }
 0xd6f   : > { %v3078_v23 = vpop.eup %3077 }
 0xd70   : > { %v1907_v24 = vmul.f32 %v3078_v23, %v3076_v40 }
 0xd72   : > { %v1909_v25 = vpack.c.bf16 %v1907_v24, %v1907_v24 }
 0xd74   : > { %2859 = vmatmul.mubr.msk.bf16.vlgmr.msra.gmra.mxu1 %vm963_vm3, %v1909_v25 }
 0xd75   : > { %2872 = vmatprep.mubr.msk.bf16.mxu1 %vm3338_vm1, %v3337_v31  ;;  %2869 = vmatpush3.bf16.msra.mxu1 %v3041_v1 }
 0xd76   : > { %2870 = vmatprep.subr.bf16.mxu1 %v3337_v31 }
 0xd79   : > { %2871 = vmatpush3.bf16.msra.mxu1 %v3042_v2 }
 0xd8d   : > { %v1952_v44 = vpop.f32.mrf.mxu0 }
 0xd8f   : > { %v2854_v26 = vpop.f32.mrf.mxu0 }
 0xd91   : > { %v1955_v27 = vpop.f32.mrf.mxu0 }
 0xd93   : > { %v2855_v28 = vpop.f32.mrf.mxu0 }
 0xe34   : > { %v2000_v29 = vpop.f32.mrf.mxu1 }
 0xe35   : > { %v2008_v30 = vpack.c.bf16 %v2000_v29, %v1952_v44 }
 0xe36   : > { %v2860_v32 = vpop.f32.mrf.mxu1 }
 0xe37   : > { %2865 = vmatmul.mubr.msk.bf16.vlgmr.msra.gmra.mxu0 %vm963_vm3, %v2008_v30 }
 0xe38   : > { %v2003_v35 = vpop.f32.mrf.mxu1  ;;  %2884 = vmatprep.mubr.msk.bf16.mxu0 %vm3338_vm1, %v3337_v31  ;;  %2877 = vmatpush3.bf16.msra.mxu0 %v3043_v18 }
 0xe39   : > { %2878 = vmatprep.subr.bf16.mxu0 %v3337_v31 }
 0xe3a   : > { %v2861_v36 = vpop.f32.mrf.mxu1 }
 0xe3c   : > { %2879 = vmatpush3.bf16.msra.mxu0 %v3044_v19 }
 0xe3d   : > { %2880 = vmatprep.subr.bf16.mxu0 %v3337_v31 }
 0xe40   : > { %2881 = vmatpush3.bf16.msra.mxu0 %v3045_v20 }
 0xe41   : > { %2882 = vmatprep.subr.bf16.mxu0 %v3337_v31 }
 0xe44   : > { %2883 = vmatpush3.bf16.msra.mxu0 %v3046_v21 }
 0xef7   : > { %v2051_v38 = vpop.f32.mrf.mxu0 }
 0xef8   : > { %v2058_v39 = vadd.f32 %v2051_v38, %v2006_v37 }
 0xef9   : > { %v2866_v41 = vpop.f32.mrf.mxu0 }
 0xefa   : > { %2060 = vst.msk [vmem:[#allocation3] sm:$0xff] %vm894_vm2, %v2058_v39 }
 0xefb   : > { %v2054_v43 = vpop.f32.mrf.mxu0 }
 0xefc   : > { %v2059_v45 = vadd.f32 %v2054_v43, %v2007_v42  ;;  %v2672_v43 = vld [vmem:[%s805_s2] ss:$0 sm:$0xff] }
 0xefd   : > { %v2867_v46 = vpop.f32.mrf.mxu0 }
 0xefe   : > { %2061 = vst.msk [vmem:[#allocation3 + $0x8] sm:$0xff] %vm894_vm2, %v2059_v45 }
 0xf01   : > { %v2062_v47 = vld [vmem:[#allocation3] sm:$0xff] }
 0xf02   : > { %v2064_v50 = vadd.f32 %v2062_v47, %v3728_v33 }
 0xf04   : > { %v2073_v51 = vadd.f32 %v2660_v48, %v2064_v50 }
 0xf05   : > { %v2063_v52 = vld [vmem:[#allocation3 + $0x8] sm:$0xff] }
 0xf06   : > { %v2077_v54 = vsel %vm894_vm2, %v2073_v51, 0.0  ;;  %v2065_v55 = vadd.f32 %v2063_v52, %v3730_v34 }
 0xf07   : > { %2078 = vadd.xlane.f32.xlu1 %v2077_v54 }
 0xf08   : > { %v2074_v56 = vadd.f32 %v2660_v48, %v2065_v55 }
 0xf0a   : > { %v2080_v57 = vsel %vm894_vm2, %v2074_v56, 0.0 }
 0xf0b   : > { %2081 = vadd.xlane.f32.xlu0 %v2080_v57 }
 0xf90   : > { %v2079_v58 = vpop.xlane.xlu1 %2078 }
 0xf91   : > { %v2084_v59 = vmul.f32 0.03125, %v2079_v58 }
 0xf93   : > { %v2086_v49 = vsub.f32 %v2073_v51, %v2084_v59 }
 0xf94   : > { %v2082_v60 = vpop.xlane.xlu0 %2081 }
 0xf95   : > { %v2085_v61 = vmul.f32 0.03125, %v2082_v60  ;;  %v2088_v62 = vmul.f32 %v2086_v49, %v2086_v49 }
 0xf97   : > { %v2087_v33 = vsub.f32 %v2074_v56, %v2085_v61  ;;  %v2090_v63 = vsel %vm894_vm2, %v2088_v62, 0.0 }
 0xf98   : > { %2091 = vadd.xlane.f32.xlu1 %v2090_v63 }
 0xf99   : > { %v2089_v0 = vmul.f32 %v2087_v33, %v2087_v33 }
 0xf9b   : > { %v2093_v34 = vsel %vm894_vm2, %v2089_v0, 0.0 }
 0xf9c   : > { %2094 = vadd.xlane.f32.xlu0 %v2093_v34 }
0x1021   : > { %v2092_v3 = vpop.xlane.xlu1 %2091 }
0x1022   : > { %v2096_v4 = vmul.f32 0.03125, %v2092_v3 }
0x1024   : > { %v2098_v5 = vadd.f32 1e-12, %v2096_v4 }
0x1025   : > { %v2095_v6 = vpop.xlane.xlu0 %2094 }
0x1026   : > { %3079 = vrsqrt.f32 %v2098_v5  ;;  %v2097_v7 = vmul.f32 0.03125, %v2095_v6  ;;  %v2673_v6 = vld [vmem:[%s808_s13] ss:$0 sm:$0xff] }
0x1028   : > { %v2099_v8 = vadd.f32 1e-12, %v2097_v7 }
0x102a   : > { %3081 = vrsqrt.f32 %v2099_v8  ;;  %v2674_v8 = vld [vmem:[%s811_s23] ss:$0 sm:$0xff] }
0x1033   : > { %v3080_v9 = vpop.eup %3079 }
0x1034   : > { %v2102_v10 = vmul.f32 %v3080_v9, %v2086_v49 }
0x1036   : > { %v2110_v14 = vmul.f32 %v2661_v11, %v2102_v10 }
0x1037   : > { %v3082_v12 = vpop.eup %3081 }
0x1038   : > { %v2103_v13 = vmul.f32 %v3082_v12, %v2087_v33  ;;  %v2118_v16 = vadd.f32 %v2662_v15, %v2110_v14 }
0x103a   : > { %v2111_v53 = vmul.f32 %v2661_v11, %v2103_v13 }
0x103c   : > { %v2119_v40 = vadd.f32 %v2662_v15, %v2111_v53 }
0x103e   : > { %v2120_v17 = vpack.c.bf16 %v2119_v40, %v2118_v16 }
0x1040   : > { %2873 = vmatmul.mubr.msk.bf16.vlgmr.msra.gmra.mxu1 %vm894_vm2, %v2120_v17 }
0x1100   : > { %v2181_v23 = vpop.f32.mrf.mxu1 }
0x1101   : > { %v2182_v24 = vadd.f32 %v2663_v22, %v2181_v23 }
0x1102   : > { %v2874_v25 = vpop.f32.mrf.mxu1 }
0x1103   : > { %v2190_v44 = vmul.f32 0.70710677, %v2182_v24  ;;  %v2188_v35 = vmul.f32 0.5, %v2182_v24 }
0x1104   : > { %v2184_v26 = vpop.f32.mrf.mxu1 }
0x1105   : > { %3083 = verf.f32 %v2190_v44  ;;  %v2185_v27 = vadd.f32 %v2663_v22, %v2184_v26 }
0x1106   : > { %v2875_v28 = vpop.f32.mrf.mxu1 }
0x1107   : > { %v2191_v29 = vmul.f32 0.70710677, %v2185_v27  ;;  %v2189_v36 = vmul.f32 0.5, %v2185_v27 }
0x1109   : > { %3085 = verf.f32 %v2191_v29 }
0x1112   : > { %v3084_v30 = vpop.eup %3083 }
0x1113   : > { %v2194_v31 = vadd.f32 1.0, %v3084_v30 }
0x1115   : > { %v2196_v38 = vmul.f32 %v2194_v31, %v2188_v35 }
0x1116   : > { %v3086_v32 = vpop.eup %3085 }
0x1117   : > { %v2195_v37 = vadd.f32 1.0, %v3086_v32 }
0x1119   : > { %v2197_v39 = vmul.f32 %v2195_v37, %v2189_v36 }
0x111b   : > { %v2198_v41 = vpack.c.bf16 %v2197_v39, %v2196_v38 }
0x111d   : > { %2885 = vmatmul.mubr.msk.bf16.vlgmr.msra.gmra.mxu0 %vm2231_vm5, %v2198_v41 }
0x11dd   : > { %v2269_v42 = vpop.f32.mrf.mxu0 }
0x11de   : > { %v2276_v45 = vadd.f32 %v2269_v42, %v2118_v16 }
0x11df   : > { %v2886_v46 = vpop.f32.mrf.mxu0 }
0x11e0   : > { %v2285_v47 = vadd.f32 %v2672_v43, %v2276_v45 }
0x11e1   : > { %v2272_v48 = vpop.f32.mrf.mxu0 }
0x11e2   : > { %v2277_v50 = vadd.f32 %v2272_v48, %v2119_v40  ;;  %v2289_v51 = vsel %vm894_vm2, %v2285_v47, 0.0 }
0x11e3   : > { %2290 = vadd.xlane.f32.xlu1 %v2289_v51  ;;  %v2887_v52 = vpop.f32.mrf.mxu0 }
0x11e4   : > { %v2286_v54 = vadd.f32 %v2672_v43, %v2277_v50 }
0x11e6   : > { %v2292_v55 = vsel %vm894_vm2, %v2286_v54, 0.0 }
0x11e7   : > { %2293 = vadd.xlane.f32.xlu0 %v2292_v55 }
0x126c   : > { %v2291_v56 = vpop.xlane.xlu1 %2290 }
0x126d   : > { %v2295_v57 = vmul.f32 0.03125, %v2291_v56 }
0x126f   : > { %v2297_v58 = vsub.f32 %v2285_v47, %v2295_v57 }
0x1270   : > { %v2294_v59 = vpop.xlane.xlu0 %2293 }
0x1271   : > { %v2296_v49 = vmul.f32 0.03125, %v2294_v59  ;;  %v2299_v60 = vmul.f32 %v2297_v58, %v2297_v58 }
0x1273   : > { %v2298_v61 = vsub.f32 %v2286_v54, %v2296_v49  ;;  %v2301_v62 = vsel %vm894_vm2, %v2299_v60, 0.0 }
0x1274   : > { %2302 = vadd.xlane.f32.xlu1 %v2301_v62 }
0x1275   : > { %v2300_v33 = vmul.f32 %v2298_v61, %v2298_v61 }
0x1277   : > { %v2304_v63 = vsel %vm894_vm2, %v2300_v33, 0.0 }
0x1278   : > { %2305 = vadd.xlane.f32.xlu0 %v2304_v63 }
0x12fd   : > { %v2303_v0 = vpop.xlane.xlu1 %2302 }
0x12fe   : > { %v2307_v34 = vmul.f32 0.03125, %v2303_v0 }
0x1300   : > { %v2309_v1 = vadd.f32 1e-12, %v2307_v34 }
0x1301   : > { %v2306_v2 = vpop.xlane.xlu0 %2305 }
0x1302   : > { %3087 = vrsqrt.f32 %v2309_v1  ;;  %v2308_v3 = vmul.f32 0.03125, %v2306_v2 }
0x1304   : > { %v2310_v4 = vadd.f32 1e-12, %v2308_v3 }
0x1306   : > { %3089 = vrsqrt.f32 %v2310_v4 }
0x130f   : > { %v3088_v5 = vpop.eup %3087 }
0x1310   : > { %v2313_v7 = vmul.f32 %v3088_v5, %v2297_v58 }
0x1312   : > { %v2321_v9 = vmul.f32 %v2673_v6, %v2313_v7 }
0x1313   : > { %v3090_v10 = vpop.eup %3089 }
0x1314   : > { %v2329_v11 = vadd.f32 %v2674_v8, %v2321_v9  ;;  %v2314_v12 = vmul.f32 %v3090_v10, %v2298_v61 }
0x1316   : > { %2331 = vst.msk [vmem:[#allocation2] sm:$0xff] %vm894_vm2, %v2329_v11  ;;  %v2322_v13 = vmul.f32 %v2673_v6, %v2314_v12  ;;  %2336 = sbr.rel (%p2675_p0) target bundleno = 4893 (0x131d), region = 108 }
0x1318   : > { %v2330_v14 = vadd.f32 %v2674_v8, %v2322_v13 }
0x131a   : > { %2332 = vst.msk [vmem:[#allocation2 + $0x8] sm:$0xff] %vm894_vm2, %v2330_v14 }
0x131b   : > { %vm2337_vm6 = vcmask 253952  }
0x131c   : > { %2338 = vst.msk [vmem:[%s3713_s6] sm:$0x1] %vm2337_vm6, %v2329_v11  ;;  %2339 = vst.msk [vmem:[%s3713_s6 + $0x1] sm:$0x1] %vm2337_vm6, %v2330_v14 }
0x131d PF: > { %s2688_s13 = sshll.u32 %s3315_s28, 5  ;;  %s4167_s22 = sld [smem:[#allocation46_spill]] }
0x131e   : > { %s2354_s17 = sshll.u32 %s3713_s6, 4  ;;  %s2341_s27 = scalar_lea.sflag [#allocation6], %s3630_s12  ;;  %s3990_s17 = int_to_ptr.vmem [resolvable:$true] %s2354_s17 }
0x131f   : > { %s3199_s21 = scalar_lea.vmem %s3990_s17, 32  ;;  %s3350_s7 = smov [#allocation12]  }
0x1320   : > { %p3200_p2 = scmp.ne.s32.totalorder %s3990_s17, %s3199_s21  ;;  %s3203_s10 = sshll.u32 %s3350_s7, 4  ;;  %s3204_s10 = int_to_ptr.vmem [resolvable:$false] %s3203_s10 }
0x1321   : > { %s3205_s28 = scalar_lea.vmem %s3204_s10, 64  ;;  %p3206_p1 = scmp.lt.s32.totalorder %s3990_s17, %s3204_s10 }
0x1322   : > { %p3201_p7 = pnand %p3200_p2, %p3563_p10  ;;  %p3207_p8 = scmp.lt.s32.totalorder %s3205_s28, %s3199_s21 }
0x1323   : > { %s4168_s1 = smov %s4167_s22  ;;  %s3987_s0 = scalar_lea.hbm %s4167_s22, %s2688_s13 }
0x1324   : > { %p3202_p6 = pneg %p3201_p7  ;;  %p3208_p3 = por %p3207_p8, %p3206_p1 }
0x1326   : > { %p3209_p12 = pnand %p3208_p3, %p3202_p6 }
0x1328   : > { %3212 = shalt.err (!%p3209_p12)
}
0x1329   : > { %s3213_s6 = scalar_lea.hbm %s3987_s0, 32  ;;  %s3217_s18 = scalar_lea.hbm %s4168_s1, 64 }
0x132a   : > { %p3214_p13 = scmp.ne.s32.totalorder %s3987_s0, %s3213_s6  ;;  %p3218_p9 = scmp.lt.s32.totalorder %s3987_s0, %s4168_s1 }
0x132b   : > { %p3219_p11 = scmp.lt.s32.totalorder %s3217_s18, %s3213_s6 }
0x132c   : > { %p3215_p4 = pnand %p3214_p13, %p3563_p10 }
0x132d   : > { %p3220_p0 = por %p3219_p11, %p3218_p9 }
0x132e   : > { %p3216_p5 = pneg %p3215_p4 }
0x1330   : > { %p3221_p2 = pnand %p3220_p0, %p3216_p5 }
0x1332   : > { %3224 = shalt.err (!%p3221_p2)
}
0x1333   : > { %s3351_s16 = smov 16   ;;  %s3352_s11 = smov 1  }
0x1334   : > { %2900 = dma.vmem_to_hbm [thread:$0]  (%p3563_p10), %s3990_s17, 32, %s3987_s0, %s2341_s27, %s3351_s16, %s3351_s16, %s3352_s11  }
0x1335 PF: > { %s4169_s15 = sld [smem:[#allocation24_spill]] }
0x1336   : > { %s4170_s24 = sld [smem:[#allocation19_spill]] }
0x1337   : > { %s4171_s2 = sld [smem:[#allocation25_spill]] }
0x133b   : > { %p2925_p7 = scmp.ge.s32.totalorder %s4169_s15, 2 }
0x133c   : > { %s2369_s3 = sand.u32 1, %s4170_s24  }
0x133d   : > { %p4172_p6 = scmp.ne.s32.totalorder %s4171_s2, 0  ;;  %s2370_s8 = scalar_lea.sflag [#allocation6], %s2369_s3 }
0x133f   : > { %p2917_p1 = pnand %p2925_p7, %p4172_p6 }
0x1341   : > { %p2918_p8 = pneg %p2917_p1 }
0x1343   : > { %3282 = dma.done.wait (%p2918_p8), %s2370_s8, 32  }
0x1344   : > { %3284 = vsyncadd (%p2918_p8), %s2370_s8, 4294967264  ;;  %s36_s0 = sadd.s32 1, %s4169_s15   ;;  %s4173_s21 = sld [smem:[#allocation17_spill]] }
0x1345   : > { %p33_p3 = scmp.ge.s32.totalorder %s36_s0, 6   ;;  %s4174_s22 = sld [smem:[#allocation18_spill]] }
0x1346   : > { %s4175_s23 = sld [smem:[#allocation29_spill]] }
0x1347   : > { %s4176_s24 = sld [smem:[#allocation20_spill]] }
0x1348   : > { %s4177_s25 = sld [smem:[#allocation21_spill]] }
0x1349   : > { %s4178_s26 = sld [smem:[#allocation30_spill]]  ;;  %35 = sbr.rel (!%p33_p3) target bundleno = 29 (0x1d), region = 197 }
0x134a   : > { %s4179_s27 = sld [smem:[#allocation22_spill]] }
0x134b   : > { %s4180_s28 = sld [smem:[#allocation23_spill]] }
0x134c   : > { %s4181_s29 = sld [smem:[#allocation27_spill]] }
0x134d   : > { %s4182_s30 = sld [smem:[#allocation28_spill]] }
0x134e   :  { %2375 = vsyncpa [#allocation5], 1 }
0x134f   :  { %2377 = vsyncpa [#allocation5 + $0x1], 1 }
0x1350   :  { %2378 = vsyncpa [#allocation8], 1 }
0x1351   :  { %2379 = vsyncpa [#allocation11], 1 }
0x1352   :  { %2381 = vsyncpa [#allocation11 + $0x1], 1 }
0x1353   :  { %2382 = vsyncpa [#allocation6], 1 }
0x1354   :  { %2384 = vsyncpa [#allocation6 + $0x1], 1 }

</bundles_post_ra>
